<compile_context>
chip_gen: v7x
topology: tpu7x:2x2x1
jax: 0.10.0
libtpu: 0.0.40
codegen_flags: <defaults>
</compile_context>

<pallas_src>
import math

import jax
import jax.numpy as jnp
from jax.experimental import pallas as pl
from jax.experimental.pallas import tpu as pltpu

B, S, H, F, VOCAB = 2, 8, 32, 64, 50     # logical model shapes
HP, FP, VP = 128, 128, 128               # lane-padded hidden / FFN / vocab dims
NB = 2 * B                               # query + candidate stacked on batch
N = NB * S                               # total flattened token rows


# ---------------------------------------------------------------------------
# In-kernel helpers (pure jnp, traced inside the Pallas body)
# ---------------------------------------------------------------------------
def _layer_norm_padded(x, g, b, lane_mask, eps=1e-12):
    # x is zero beyond the first H lanes; g/b are also zero there, so the
    # output stays zero-padded.  Centered two-pass variance (review fix):
    # mean((x-mu)^2) over the true H lanes, no E[x^2]-mu^2 cancellation.
    mu = jnp.sum(x, axis=-1, keepdims=True) * (1.0 / H)
    d = (x - mu) * lane_mask
    var = jnp.sum(d * d, axis=-1, keepdims=True) * (1.0 / H)
    return d * jax.lax.rsqrt(var + eps) * g + b


def _gelu(x):
    # tanh approximation (BERT-style).
    # TODO(synk): PyTorch nn.GELU defaults to the exact erf form; erf has no
    # guaranteed Mosaic lowering, so the tanh approximation is kept.
    c = math.sqrt(2.0 / math.pi)
    return 0.5 * x * (1.0 + jnp.tanh(c * (x + 0.044715 * x * x * x)))


def _log1p(t):
    # log1p(t) for t in (0, 1] via the Kahan/Goldberg correction -- full fp32
    # accuracy for tiny t without relying on a dedicated log1p lowering.
    u = 1.0 + t
    return jnp.where(u == 1.0, t, jnp.log(u) * (t / (u - 1.0)))


# ---------------------------------------------------------------------------
# Fused kernel: embeddings -> encoder (q & c stacked) -> CLS -> Linear ->
#               pairwise score -> BCEWithLogits loss
# ---------------------------------------------------------------------------
def fused_biencoder_kernel(ids_ref, seg_ref, kmask_ref, label_ref, pw_ref,
                           wemb_ref, segtab_ref, pos_ref, blockbias_ref,
                           wqkv_ref, wo_ref, w1_ref, w2_ref, ln_ref,
                           lin_wt_ref, lin_b_ref, score_ref, loss_ref):
    # TODO(synk): the pretrained multi-layer multi-head BertModel/RobertaModel
    # cannot be loaded here; it is replaced by a synthetic single-layer,
    # single-head transformer encoder with deterministic weights.
    ln = ln_ref[...]                                         # [6, HP] fp32
    lane = jax.lax.broadcasted_iota(jnp.int32, (1, HP), 1)
    lane_mask = (lane < H).astype(jnp.float32)               # [1, HP]

    # --- embeddings, fully in-kernel (no [2B,S,HP] HBM round-trip) ---------
    one_hot = (ids_ref[...] ==
               jax.lax.broadcasted_iota(jnp.int32, (N, VP), 1)
               ).astype(jnp.float32)                         # [N, VP]
    word = jnp.dot(one_hot, wemb_ref[...],
                   preferred_element_type=jnp.float32)       # [N, HP]
    segtab = segtab_ref[...]                                 # [2, HP]: e0, e1-e0
    seg_e = segtab[0:1, :] + seg_ref[...] * segtab[1:2, :]   # [N, HP]
    x = word + seg_e + pos_ref[...]                          # [N, HP] fp32
    x = _layer_norm_padded(x, ln[0], ln[1], lane_mask)       # embedding LN
    xb = x.astype(jnp.bfloat16)

    # --- self-attention: fused QKV + flattened block-diagonal attention ----
    qkv = jnp.dot(xb, wqkv_ref[...],
                  preferred_element_type=jnp.float32)        # [N, 3*HP]
    q = qkv[:, 0 * HP:1 * HP].astype(jnp.bfloat16)           # 1/sqrt(H) in wq
    k = qkv[:, 1 * HP:2 * HP].astype(jnp.bfloat16)
    v = qkv[:, 2 * HP:3 * HP].astype(jnp.bfloat16)
    scores = jnp.einsum('qd,kd->qk', q, k,
                        preferred_element_type=jnp.float32)  # [N, N]
    # static block-diagonal -1e9 (no cross-sequence attention) + key padding
    scores = scores + blockbias_ref[...] + (1.0 - kmask_ref[...]) * (-1e9)
    m = jnp.max(scores, axis=-1, keepdims=True)
    p = jnp.exp(scores - m)
    attn = p * pl.reciprocal(jnp.sum(p, axis=-1, keepdims=True), approx=True)
    ctx = jnp.dot(attn.astype(jnp.bfloat16), v,
                  preferred_element_type=jnp.float32)        # [N, HP]
    ao = jnp.dot(ctx.astype(jnp.bfloat16), wo_ref[...],
                 preferred_element_type=jnp.float32)
    x1 = _layer_norm_padded(x + ao, ln[2], ln[3], lane_mask)

    # --- FFN ---------------------------------------------------------------
    f = _gelu(jnp.dot(x1.astype(jnp.bfloat16), w1_ref[...],
                      preferred_element_type=jnp.float32))
    f = jnp.dot(f.astype(jnp.bfloat16), w2_ref[...],
                preferred_element_type=jnp.float32)
    x2 = _layer_norm_padded(x1 + f, ln[4], ln[5], lane_mask) # last_hidden_state

    # --- head: Linear on all rows -> CLS gather -> score -> BCEWithLogits ---
    e_all = jnp.dot(x2.astype(jnp.bfloat16), lin_wt_ref[...],
                    preferred_element_type=jnp.float32) + lin_b_ref[...]  # [N,HP]
    e = e_all.reshape(NB, S, HP)[:, 0, :]                    # CLS rows [NB, HP]
    eq, ec = e[:B], e[B:]
    sc = jnp.sum(eq * ec, axis=-1, keepdims=True)            # torch.bmm -> [B,1]

    # BCEWithLogitsLoss(reduction='mean', pos_weight=pw), numerically stable.
    # pl.reciprocal(approx=True) above and the tanh GELU are deliberate
    # speed/parity trade-offs.
    y = label_ref[...]                                       # [B, 1]
    pw = pw_ref[...]                                         # [1, 1]
    lw = 1.0 + (pw - 1.0) * y
    softplus_neg = jnp.maximum(-sc, 0.0) + _log1p(jnp.exp(-jnp.abs(sc)))
    per = (1.0 - y) * sc + lw * softplus_neg
    mean_loss = jnp.mean(per, axis=0, keepdims=True)         # [1, 1]

    # lane-dense outputs (unmasked vst); wrapper slices column 0.
    score_ref[...] = jnp.broadcast_to(sc, (B, HP))
    loss_ref[...] = jnp.broadcast_to(mean_loss, (1, HP))


# ---------------------------------------------------------------------------
# Wrappers (glue)
# ---------------------------------------------------------------------------
_VMEM = pl.BlockSpec(memory_space=pltpu.MemorySpace.VMEM)


def _run_fused(p, ids_all, seg_all, key_mask, label2d, pw2d):
    # TODO(synk): on v7x, add a grid with a "parallel" axis over the stacked
    # batch (dimension_semantics) to use the second TensorCore; at this toy
    # size the cross-core combine for the score/loss head would dominate.
    score_blk, loss_blk = pl.pallas_call(
        fused_biencoder_kernel,
        out_shape=(jax.ShapeDtypeStruct((B, HP), jnp.float32),
                   jax.ShapeDtypeStruct((1, HP), jnp.float32)),
        in_specs=[_VMEM] * 16,
        out_specs=(_VMEM, _VMEM),
    )(ids_all, seg_all, key_mask, label2d, pw2d,
      p["word_emb"], p["seg_tab"], p["pos_tiled"], p["block_bias"],
      p["wqkv"], p["wo"], p["w1"], p["w2"], p["ln"], p["lin_wt"], p["lin_b"])
    return score_blk[:, 0], loss_blk[0, 0]   # score [B] (torch.squeeze), loss scalar


@jax.jit
def biencoder_forward(p, ids_q, mask_q, seg_q, ids_c, mask_c, seg_c,
                      label2d, pw2d):
    # Only tiny (<=32-element) index/mask plumbing stays in XLA; everything
    # [N,HP]-sized happens inside the single fused kernel.
    ids_all = jnp.concatenate([ids_q, ids_c], axis=0).reshape(N, 1)
    seg_all = jnp.concatenate([seg_q, seg_c], axis=0).reshape(N, 1).astype(jnp.float32)
    key_mask = jnp.concatenate([mask_q, mask_c], axis=0
                               ).astype(jnp.float32).reshape(1, N)
    return _run_fused(p, ids_all, seg_all, key_mask, label2d, pw2d)


def _pad2(w, r, c):
    out = jnp.zeros((r, c), w.dtype)
    return out.at[:w.shape[0], :w.shape[1]].set(w)


def init_params(key):
    ks = jax.random.split(key, 11)
    n = lambda k, shape, s=0.02: (s * jax.random.normal(k, shape)).astype(jnp.float32)

    # embedding tables (word lookup done in-kernel as one-hot MXU matmul)
    word_emb = _pad2(n(ks[0], (VOCAB, H)), VP, HP)
    seg_raw = n(ks[1], (2, H))
    seg_tab = _pad2(jnp.stack([seg_raw[0], seg_raw[1] - seg_raw[0]], axis=0), 2, HP)
    pos_tiled = jnp.tile(_pad2(n(ks[2], (S, H)), S, HP), (NB, 1))        # [N, HP]

    # static block-diagonal attention bias (stacked sequences never attend
    # across each other); per-call key padding mask is added in-kernel.
    blk = jnp.arange(N) // S
    block_bias = jnp.where(blk[:, None] == blk[None, :], 0.0, -1e9
                           ).astype(jnp.float32)                          # [N, N]

    gamma = jnp.zeros((1, HP), jnp.float32).at[:, :H].set(1.0)
    beta = jnp.zeros((1, HP), jnp.float32)
    ln = jnp.concatenate([gamma, beta] * 3, axis=0)                       # [6, HP]

    bf = lambda w, r, c: _pad2(w, r, c).astype(jnp.bfloat16)
    wq = n(ks[3], (H, H)) * (1.0 / math.sqrt(H))     # fold 1/sqrt(H) into wq
    wqkv = jnp.concatenate([_pad2(wq, HP, HP),
                            _pad2(n(ks[4], (H, H)), HP, HP),
                            _pad2(n(ks[5], (H, H)), HP, HP)],
                           axis=1).astype(jnp.bfloat16)                   # [HP, 3*HP]
    lin_w = n(ks[9], (H, H))                         # nn.Linear weight [out, in]
    return dict(
        word_emb=word_emb, seg_tab=seg_tab, pos_tiled=pos_tiled,
        block_bias=block_bias,
        wqkv=wqkv, wo=bf(n(ks[6], (H, H)), HP, HP),
        w1=bf(n(ks[7], (H, F)), HP, FP), w2=bf(n(ks[8], (F, H)), FP, HP),
        ln=ln,
        lin_wt=bf(lin_w.T, HP, HP),                  # W.T padded, bf16 (once)
        lin_b=_pad2(n(ks[10], (H,)).reshape(1, H), 1, HP),
    )


if __name__ == "__main__":
    key = jax.random.PRNGKey(0)
    pkey, k1, k2, k3 = jax.random.split(key, 4)
    params = init_params(pkey)

    input_ids_q = jax.random.randint(k1, (B, S), 0, VOCAB, dtype=jnp.int32)
    input_ids_c = jax.random.randint(k2, (B, S), 0, VOCAB, dtype=jnp.int32)
    input_mask_q = jnp.ones((B, S), jnp.float32)
    input_mask_c = jnp.ones((B, S), jnp.float32)
    segment_ids_q = jnp.zeros((B, S), jnp.int32)
    segment_ids_c = jnp.zeros((B, S), jnp.int32)
    label = jax.random.bernoulli(k3, 0.5, (B,)).astype(jnp.float32)
    label2d = label.reshape(B, 1)                 # shaped once, off the hot path
    pos_weight = jnp.full((1, 1), 2.0, jnp.float32)

    score, loss = biencoder_forward(params, input_ids_q, input_mask_q, segment_ids_q,
                                    input_ids_c, input_mask_c, segment_ids_c,
                                    label2d, pos_weight)
    jax.block_until_ready((score, loss))
    assert score.shape == (B,) and loss.shape == ()
    print("KERNEL_OK")
</pallas_src>

<mosaic_0001>
module attributes {stable_mosaic.version = 11 : i64} {
  func.func @fused_biencoder_kernel(%arg0: memref<32x1xi32, #tpu.memory_space<vmem>>, %arg1: memref<32x1xf32, #tpu.memory_space<vmem>>, %arg2: memref<1x32xf32, #tpu.memory_space<vmem>>, %arg3: memref<2x1xf32, #tpu.memory_space<vmem>>, %arg4: memref<1x1xf32, #tpu.memory_space<vmem>>, %arg5: memref<128x128xf32, #tpu.memory_space<vmem>>, %arg6: memref<2x128xf32, #tpu.memory_space<vmem>>, %arg7: memref<32x128xf32, #tpu.memory_space<vmem>>, %arg8: memref<32x32xf32, #tpu.memory_space<vmem>>, %arg9: memref<128x384xbf16, #tpu.memory_space<vmem>>, %arg10: memref<128x128xbf16, #tpu.memory_space<vmem>>, %arg11: memref<128x128xbf16, #tpu.memory_space<vmem>>, %arg12: memref<128x128xbf16, #tpu.memory_space<vmem>>, %arg13: memref<6x128xf32, #tpu.memory_space<vmem>>, %arg14: memref<128x128xbf16, #tpu.memory_space<vmem>>, %arg15: memref<1x128xf32, #tpu.memory_space<vmem>>, %arg16: memref<2x128xf32, #tpu.memory_space<vmem>>, %arg17: memref<1x128xf32, #tpu.memory_space<vmem>>) attributes {dimension_semantics = [], scalar_prefetch = 0 : i64, scratch_operands = 0 : i64, tpu.core_type = #tpu.core_type<tc>} {
    %c0 = arith.constant 0 : index
    %c0_0 = arith.constant 0 : index
    %0 = vector.load %arg13[%c0, %c0_0] : memref<6x128xf32, #tpu.memory_space<vmem>>, vector<6x128xf32>
    %1 = tpu.iota {dimensions = array<i32: 1>} : vector<1x128xi32>
    %c32_i32 = arith.constant 32 : i32
    %2 = vector.broadcast %c32_i32 : i32 to vector<1x128xi32>
    %3 = arith.cmpi slt, %1, %2 : vector<1x128xi32>
    %4 = arith.extui %3 : vector<1x128xi1> to vector<1x128xi32>
    %5 = arith.sitofp %4 : vector<1x128xi32> to vector<1x128xf32>
    %c0_1 = arith.constant 0 : index
    %c0_2 = arith.constant 0 : index
    %6 = vector.load %arg0[%c0_1, %c0_2] : memref<32x1xi32, #tpu.memory_space<vmem>>, vector<32x1xi32>
    %7 = tpu.iota {dimensions = array<i32: 1>} : vector<32x128xi32>
    %8 = vector.broadcast %6 : vector<32x1xi32> to vector<32x128xi32>
    %9 = arith.cmpi eq, %8, %7 : vector<32x128xi32>
    %10 = arith.extui %9 : vector<32x128xi1> to vector<32x128xi32>
    %11 = arith.sitofp %10 : vector<32x128xi32> to vector<32x128xf32>
    %c0_3 = arith.constant 0 : index
    %c0_4 = arith.constant 0 : index
    %12 = vector.load %arg5[%c0_3, %c0_4] : memref<128x128xf32, #tpu.memory_space<vmem>>, vector<128x128xf32>
    %cst = arith.constant dense<0.000000e+00> : vector<32x128xf32>
    %13 = tpu.matmul %11, %12, %cst {dimension_numbers = #tpu.dot_dimension_numbers<[1], [0], [0], [1], [0, 0, 1, 1], [], []>} : vector<32x128xf32>, vector<128x128xf32>, vector<32x128xf32> -> vector<32x128xf32>
    %c0_5 = arith.constant 0 : index
    %c0_6 = arith.constant 0 : index
    %14 = vector.load %arg6[%c0_5, %c0_6] : memref<2x128xf32, #tpu.memory_space<vmem>>, vector<2x128xf32>
    %15 = vector.extract_strided_slice %14 {offsets = [0, 0], sizes = [1, 128], strides = [1, 1]} : vector<2x128xf32> to vector<1x128xf32>
    %c0_7 = arith.constant 0 : index
    %c0_8 = arith.constant 0 : index
    %16 = vector.load %arg1[%c0_7, %c0_8] : memref<32x1xf32, #tpu.memory_space<vmem>>, vector<32x1xf32>
    %17 = vector.extract_strided_slice %14 {offsets = [1, 0], sizes = [1, 128], strides = [1, 1]} : vector<2x128xf32> to vector<1x128xf32>
    %18 = vector.broadcast %16 : vector<32x1xf32> to vector<32x128xf32>
    %19 = vector.broadcast %17 : vector<1x128xf32> to vector<32x128xf32>
    %20 = arith.mulf %18, %19 : vector<32x128xf32>
    %21 = vector.broadcast %15 : vector<1x128xf32> to vector<32x128xf32>
    %22 = arith.addf %21, %20 : vector<32x128xf32>
    %23 = arith.addf %13, %22 : vector<32x128xf32>
    %c0_9 = arith.constant 0 : index
    %c0_10 = arith.constant 0 : index
    %24 = vector.load %arg7[%c0_9, %c0_10] : memref<32x128xf32, #tpu.memory_space<vmem>>, vector<32x128xf32>
    %25 = arith.addf %23, %24 : vector<32x128xf32>
    %26 = vector.extract_strided_slice %0 {offsets = [0, 0], sizes = [1, 128], strides = [1, 1]} : vector<6x128xf32> to vector<1x128xf32>
    %27 = vector.shape_cast %26 : vector<1x128xf32> to vector<128xf32>
    %28 = vector.extract_strided_slice %0 {offsets = [1, 0], sizes = [1, 128], strides = [1, 1]} : vector<6x128xf32> to vector<1x128xf32>
    %29 = vector.shape_cast %28 : vector<1x128xf32> to vector<128xf32>
    %cst_11 = arith.constant dense<0.000000e+00> : vector<32xf32>
    %30 = vector.multi_reduction <add>, %25, %cst_11 [1] : vector<32x128xf32> to vector<32xf32>
    %31 = vector.shape_cast %30 : vector<32xf32> to vector<32x1xf32>
    %cst_12 = arith.constant 3.125000e-02 : f32
    %32 = vector.broadcast %cst_12 : f32 to vector<32x1xf32>
    %33 = arith.mulf %31, %32 : vector<32x1xf32>
    %34 = vector.broadcast %33 : vector<32x1xf32> to vector<32x128xf32>
    %35 = arith.subf %25, %34 : vector<32x128xf32>
    %36 = vector.broadcast %5 : vector<1x128xf32> to vector<32x128xf32>
    %37 = arith.mulf %35, %36 : vector<32x128xf32>
    %38 = arith.mulf %37, %37 : vector<32x128xf32>
    %cst_13 = arith.constant dense<0.000000e+00> : vector<32xf32>
    %39 = vector.multi_reduction <add>, %38, %cst_13 [1] : vector<32x128xf32> to vector<32xf32>
    %40 = vector.shape_cast %39 : vector<32xf32> to vector<32x1xf32>
    %cst_14 = arith.constant 3.125000e-02 : f32
    %41 = vector.broadcast %cst_14 : f32 to vector<32x1xf32>
    %42 = arith.mulf %40, %41 : vector<32x1xf32>
    %cst_15 = arith.constant 9.99999996E-13 : f32
    %43 = vector.broadcast %cst_15 : f32 to vector<32x1xf32>
    %44 = arith.addf %42, %43 : vector<32x1xf32>
    %45 = math.rsqrt %44 : vector<32x1xf32>
    %46 = vector.broadcast %45 : vector<32x1xf32> to vector<32x128xf32>
    %47 = arith.mulf %37, %46 : vector<32x128xf32>
    %48 = vector.shape_cast %27 : vector<128xf32> to vector<1x128xf32>
    %49 = vector.broadcast %48 : vector<1x128xf32> to vector<32x128xf32>
    %50 = arith.mulf %47, %49 : vector<32x128xf32>
    %51 = vector.shape_cast %29 : vector<128xf32> to vector<1x128xf32>
    %52 = vector.broadcast %51 : vector<1x128xf32> to vector<32x128xf32>
    %53 = arith.addf %50, %52 : vector<32x128xf32>
    %54 = arith.truncf %53 : vector<32x128xf32> to vector<32x128xbf16>
    %c0_16 = arith.constant 0 : index
    %c0_17 = arith.constant 0 : index
    %55 = vector.load %arg9[%c0_16, %c0_17] : memref<128x384xbf16, #tpu.memory_space<vmem>>, vector<128x384xbf16>
    %cst_18 = arith.constant dense<0.000000e+00> : vector<32x384xf32>
    %56 = tpu.matmul %54, %55, %cst_18 {dimension_numbers = #tpu.dot_dimension_numbers<[1], [0], [0], [1], [0, 0, 1, 1], [], []>} : vector<32x128xbf16>, vector<128x384xbf16>, vector<32x384xf32> -> vector<32x384xf32>
    %57 = vector.extract_strided_slice %56 {offsets = [0, 0], sizes = [32, 128], strides = [1, 1]} : vector<32x384xf32> to vector<32x128xf32>
    %58 = arith.truncf %57 : vector<32x128xf32> to vector<32x128xbf16>
    %59 = vector.extract_strided_slice %56 {offsets = [0, 128], sizes = [32, 128], strides = [1, 1]} : vector<32x384xf32> to vector<32x128xf32>
    %60 = arith.truncf %59 : vector<32x128xf32> to vector<32x128xbf16>
    %61 = vector.extract_strided_slice %56 {offsets = [0, 256], sizes = [32, 128], strides = [1, 1]} : vector<32x384xf32> to vector<32x128xf32>
    %62 = arith.truncf %61 : vector<32x128xf32> to vector<32x128xbf16>
    "tpu.trace_start"() <{level = 10 : i32, message = "qd,kd->qk"}> : () -> ()
    %cst_19 = arith.constant dense<0.000000e+00> : vector<32x32xf32>
    %63 = tpu.matmul %58, %60, %cst_19 {dimension_numbers = #tpu.dot_dimension_numbers<[1], [1], [0], [0], [0, 0, 1, 0], [], []>} : vector<32x128xbf16>, vector<32x128xbf16>, vector<32x32xf32> -> vector<32x32xf32>
    "tpu.trace_stop"() : () -> ()
    %c0_20 = arith.constant 0 : index
    %c0_21 = arith.constant 0 : index
    %64 = vector.load %arg8[%c0_20, %c0_21] : memref<32x32xf32, #tpu.memory_space<vmem>>, vector<32x32xf32>
    %65 = arith.addf %63, %64 : vector<32x32xf32>
    %c0_22 = arith.constant 0 : index
    %c0_23 = arith.constant 0 : index
    %66 = vector.load %arg2[%c0_22, %c0_23] : memref<1x32xf32, #tpu.memory_space<vmem>>, vector<1x32xf32>
    %cst_24 = arith.constant 1.000000e+00 : f32
    %67 = vector.broadcast %cst_24 : f32 to vector<1x32xf32>
    %68 = arith.subf %67, %66 : vector<1x32xf32>
    %cst_25 = arith.constant -1.000000e+09 : f32
    %69 = vector.broadcast %cst_25 : f32 to vector<1x32xf32>
    %70 = arith.mulf %68, %69 : vector<1x32xf32>
    %71 = vector.broadcast %70 : vector<1x32xf32> to vector<32x32xf32>
    %72 = arith.addf %65, %71 : vector<32x32xf32>
    %cst_26 = arith.constant dense<0xFF800000> : vector<32xf32>
    %73 = vector.multi_reduction <maximumf>, %72, %cst_26 [1] : vector<32x32xf32> to vector<32xf32>
    %74 = vector.shape_cast %73 : vector<32xf32> to vector<32x1xf32>
    %75 = vector.broadcast %74 : vector<32x1xf32> to vector<32x32xf32>
    %76 = arith.subf %72, %75 : vector<32x32xf32>
    %77 = math.exp %76 : vector<32x32xf32>
    %cst_27 = arith.constant dense<0.000000e+00> : vector<32xf32>
    %78 = vector.multi_reduction <add>, %77, %cst_27 [1] : vector<32x32xf32> to vector<32xf32>
    %79 = vector.shape_cast %78 : vector<32xf32> to vector<32x1xf32>
    %80 = tpu.reciprocal %79 {approx = true} : vector<32x1xf32> -> vector<32x1xf32>
    %81 = vector.broadcast %80 : vector<32x1xf32> to vector<32x32xf32>
    %82 = arith.mulf %77, %81 : vector<32x32xf32>
    %83 = arith.truncf %82 : vector<32x32xf32> to vector<32x32xbf16>
    %cst_28 = arith.constant dense<0.000000e+00> : vector<32x128xf32>
    %84 = tpu.matmul %83, %62, %cst_28 {dimension_numbers = #tpu.dot_dimension_numbers<[1], [0], [0], [1], [0, 0, 1, 1], [], []>} : vector<32x32xbf16>, vector<32x128xbf16>, vector<32x128xf32> -> vector<32x128xf32>
    %85 = arith.truncf %84 : vector<32x128xf32> to vector<32x128xbf16>
    %c0_29 = arith.constant 0 : index
    %c0_30 = arith.constant 0 : index
    %86 = vector.load %arg10[%c0_29, %c0_30] : memref<128x128xbf16, #tpu.memory_space<vmem>>, vector<128x128xbf16>
    %cst_31 = arith.constant dense<0.000000e+00> : vector<32x128xf32>
    %87 = tpu.matmul %85, %86, %cst_31 {dimension_numbers = #tpu.dot_dimension_numbers<[1], [0], [0], [1], [0, 0, 1, 1], [], []>} : vector<32x128xbf16>, vector<128x128xbf16>, vector<32x128xf32> -> vector<32x128xf32>
    %88 = arith.addf %53, %87 : vector<32x128xf32>
    %89 = vector.extract_strided_slice %0 {offsets = [2, 0], sizes = [1, 128], strides = [1, 1]} : vector<6x128xf32> to vector<1x128xf32>
    %90 = vector.shape_cast %89 : vector<1x128xf32> to vector<128xf32>
    %91 = vector.extract_strided_slice %0 {offsets = [3, 0], sizes = [1, 128], strides = [1, 1]} : vector<6x128xf32> to vector<1x128xf32>
    %92 = vector.shape_cast %91 : vector<1x128xf32> to vector<128xf32>
    %cst_32 = arith.constant dense<0.000000e+00> : vector<32xf32>
    %93 = vector.multi_reduction <add>, %88, %cst_32 [1] : vector<32x128xf32> to vector<32xf32>
    %94 = vector.shape_cast %93 : vector<32xf32> to vector<32x1xf32>
    %cst_33 = arith.constant 3.125000e-02 : f32
    %95 = vector.broadcast %cst_33 : f32 to vector<32x1xf32>
    %96 = arith.mulf %94, %95 : vector<32x1xf32>
    %97 = vector.broadcast %96 : vector<32x1xf32> to vector<32x128xf32>
    %98 = arith.subf %88, %97 : vector<32x128xf32>
    %99 = vector.broadcast %5 : vector<1x128xf32> to vector<32x128xf32>
    %100 = arith.mulf %98, %99 : vector<32x128xf32>
    %101 = arith.mulf %100, %100 : vector<32x128xf32>
    %cst_34 = arith.constant dense<0.000000e+00> : vector<32xf32>
    %102 = vector.multi_reduction <add>, %101, %cst_34 [1] : vector<32x128xf32> to vector<32xf32>
    %103 = vector.shape_cast %102 : vector<32xf32> to vector<32x1xf32>
    %cst_35 = arith.constant 3.125000e-02 : f32
    %104 = vector.broadcast %cst_35 : f32 to vector<32x1xf32>
    %105 = arith.mulf %103, %104 : vector<32x1xf32>
    %cst_36 = arith.constant 9.99999996E-13 : f32
    %106 = vector.broadcast %cst_36 : f32 to vector<32x1xf32>
    %107 = arith.addf %105, %106 : vector<32x1xf32>
    %108 = math.rsqrt %107 : vector<32x1xf32>
    %109 = vector.broadcast %108 : vector<32x1xf32> to vector<32x128xf32>
    %110 = arith.mulf %100, %109 : vector<32x128xf32>
    %111 = vector.shape_cast %90 : vector<128xf32> to vector<1x128xf32>
    %112 = vector.broadcast %111 : vector<1x128xf32> to vector<32x128xf32>
    %113 = arith.mulf %110, %112 : vector<32x128xf32>
    %114 = vector.shape_cast %92 : vector<128xf32> to vector<1x128xf32>
    %115 = vector.broadcast %114 : vector<1x128xf32> to vector<32x128xf32>
    %116 = arith.addf %113, %115 : vector<32x128xf32>
    %117 = arith.truncf %116 : vector<32x128xf32> to vector<32x128xbf16>
    %c0_37 = arith.constant 0 : index
    %c0_38 = arith.constant 0 : index
    %118 = vector.load %arg11[%c0_37, %c0_38] : memref<128x128xbf16, #tpu.memory_space<vmem>>, vector<128x128xbf16>
    %cst_39 = arith.constant dense<0.000000e+00> : vector<32x128xf32>
    %119 = tpu.matmul %117, %118, %cst_39 {dimension_numbers = #tpu.dot_dimension_numbers<[1], [0], [0], [1], [0, 0, 1, 1], [], []>} : vector<32x128xbf16>, vector<128x128xbf16>, vector<32x128xf32> -> vector<32x128xf32>
    %cst_40 = arith.constant 5.000000e-01 : f32
    %120 = vector.broadcast %cst_40 : f32 to vector<32x128xf32>
    %121 = arith.mulf %120, %119 : vector<32x128xf32>
    %cst_41 = arith.constant 4.471500e-02 : f32
    %122 = vector.broadcast %cst_41 : f32 to vector<32x128xf32>
    %123 = arith.mulf %122, %119 : vector<32x128xf32>
    %124 = arith.mulf %123, %119 : vector<32x128xf32>
    %125 = arith.mulf %124, %119 : vector<32x128xf32>
    %126 = arith.addf %119, %125 : vector<32x128xf32>
    %cst_42 = arith.constant 0.797884583 : f32
    %127 = vector.broadcast %cst_42 : f32 to vector<32x128xf32>
    %128 = arith.mulf %127, %126 : vector<32x128xf32>
    %129 = math.tanh %128 : vector<32x128xf32>
    %cst_43 = arith.constant 1.000000e+00 : f32
    %130 = vector.broadcast %cst_43 : f32 to vector<32x128xf32>
    %131 = arith.addf %130, %129 : vector<32x128xf32>
    %132 = arith.mulf %121, %131 : vector<32x128xf32>
    %133 = arith.truncf %132 : vector<32x128xf32> to vector<32x128xbf16>
    %c0_44 = arith.constant 0 : index
    %c0_45 = arith.constant 0 : index
    %134 = vector.load %arg12[%c0_44, %c0_45] : memref<128x128xbf16, #tpu.memory_space<vmem>>, vector<128x128xbf16>
    %cst_46 = arith.constant dense<0.000000e+00> : vector<32x128xf32>
    %135 = tpu.matmul %133, %134, %cst_46 {dimension_numbers = #tpu.dot_dimension_numbers<[1], [0], [0], [1], [0, 0, 1, 1], [], []>} : vector<32x128xbf16>, vector<128x128xbf16>, vector<32x128xf32> -> vector<32x128xf32>
    %136 = arith.addf %116, %135 : vector<32x128xf32>
    %137 = vector.extract_strided_slice %0 {offsets = [4, 0], sizes = [1, 128], strides = [1, 1]} : vector<6x128xf32> to vector<1x128xf32>
    %138 = vector.shape_cast %137 : vector<1x128xf32> to vector<128xf32>
    %139 = vector.extract_strided_slice %0 {offsets = [5, 0], sizes = [1, 128], strides = [1, 1]} : vector<6x128xf32> to vector<1x128xf32>
    %140 = vector.shape_cast %139 : vector<1x128xf32> to vector<128xf32>
    %cst_47 = arith.constant dense<0.000000e+00> : vector<32xf32>
    %141 = vector.multi_reduction <add>, %136, %cst_47 [1] : vector<32x128xf32> to vector<32xf32>
    %142 = vector.shape_cast %141 : vector<32xf32> to vector<32x1xf32>
    %cst_48 = arith.constant 3.125000e-02 : f32
    %143 = vector.broadcast %cst_48 : f32 to vector<32x1xf32>
    %144 = arith.mulf %142, %143 : vector<32x1xf32>
    %145 = vector.broadcast %144 : vector<32x1xf32> to vector<32x128xf32>
    %146 = arith.subf %136, %145 : vector<32x128xf32>
    %147 = vector.broadcast %5 : vector<1x128xf32> to vector<32x128xf32>
    %148 = arith.mulf %146, %147 : vector<32x128xf32>
    %149 = arith.mulf %148, %148 : vector<32x128xf32>
    %cst_49 = arith.constant dense<0.000000e+00> : vector<32xf32>
    %150 = vector.multi_reduction <add>, %149, %cst_49 [1] : vector<32x128xf32> to vector<32xf32>
    %151 = vector.shape_cast %150 : vector<32xf32> to vector<32x1xf32>
    %cst_50 = arith.constant 3.125000e-02 : f32
    %152 = vector.broadcast %cst_50 : f32 to vector<32x1xf32>
    %153 = arith.mulf %151, %152 : vector<32x1xf32>
    %cst_51 = arith.constant 9.99999996E-13 : f32
    %154 = vector.broadcast %cst_51 : f32 to vector<32x1xf32>
    %155 = arith.addf %153, %154 : vector<32x1xf32>
    %156 = math.rsqrt %155 : vector<32x1xf32>
    %157 = vector.broadcast %156 : vector<32x1xf32> to vector<32x128xf32>
    %158 = arith.mulf %148, %157 : vector<32x128xf32>
    %159 = vector.shape_cast %138 : vector<128xf32> to vector<1x128xf32>
    %160 = vector.broadcast %159 : vector<1x128xf32> to vector<32x128xf32>
    %161 = arith.mulf %158, %160 : vector<32x128xf32>
    %162 = vector.shape_cast %140 : vector<128xf32> to vector<1x128xf32>
    %163 = vector.broadcast %162 : vector<1x128xf32> to vector<32x128xf32>
    %164 = arith.addf %161, %163 : vector<32x128xf32>
    %165 = arith.truncf %164 : vector<32x128xf32> to vector<32x128xbf16>
    %c0_52 = arith.constant 0 : index
    %c0_53 = arith.constant 0 : index
    %166 = vector.load %arg14[%c0_52, %c0_53] : memref<128x128xbf16, #tpu.memory_space<vmem>>, vector<128x128xbf16>
    %cst_54 = arith.constant dense<0.000000e+00> : vector<32x128xf32>
    %167 = tpu.matmul %165, %166, %cst_54 {dimension_numbers = #tpu.dot_dimension_numbers<[1], [0], [0], [1], [0, 0, 1, 1], [], []>} : vector<32x128xbf16>, vector<128x128xbf16>, vector<32x128xf32> -> vector<32x128xf32>
    %c0_55 = arith.constant 0 : index
    %c0_56 = arith.constant 0 : index
    %168 = vector.load %arg15[%c0_55, %c0_56] : memref<1x128xf32, #tpu.memory_space<vmem>>, vector<1x128xf32>
    %169 = vector.broadcast %168 : vector<1x128xf32> to vector<32x128xf32>
    %170 = arith.addf %167, %169 : vector<32x128xf32>
    %171 = vector.shape_cast %170 : vector<32x128xf32> to vector<4x8x128xf32>
    %172 = vector.extract_strided_slice %171 {offsets = [0, 0, 0], sizes = [4, 1, 128], strides = [1, 1, 1]} : vector<4x8x128xf32> to vector<4x1x128xf32>
    %173 = vector.shape_cast %172 : vector<4x1x128xf32> to vector<4x128xf32>
    %174 = vector.extract_strided_slice %173 {offsets = [0, 0], sizes = [2, 128], strides = [1, 1]} : vector<4x128xf32> to vector<2x128xf32>
    %175 = vector.extract_strided_slice %173 {offsets = [2, 0], sizes = [2, 128], strides = [1, 1]} : vector<4x128xf32> to vector<2x128xf32>
    %176 = arith.mulf %174, %175 : vector<2x128xf32>
    %cst_57 = arith.constant dense<0.000000e+00> : vector<2xf32>
    %177 = vector.multi_reduction <add>, %176, %cst_57 [1] : vector<2x128xf32> to vector<2xf32>
    %178 = vector.shape_cast %177 : vector<2xf32> to vector<2x1xf32>
    %c0_58 = arith.constant 0 : index
    %c0_59 = arith.constant 0 : index
    %179 = vector.load %arg3[%c0_58, %c0_59] : memref<2x1xf32, #tpu.memory_space<vmem>>, vector<2x1xf32>
    %c0_60 = arith.constant 0 : index
    %c0_61 = arith.constant 0 : index
    %180 = vector.load %arg4[%c0_60, %c0_61] : memref<1x1xf32, #tpu.memory_space<vmem>>, vector<1x1xf32>
    %cst_62 = arith.constant 1.000000e+00 : f32
    %181 = vector.broadcast %cst_62 : f32 to vector<1x1xf32>
    %182 = arith.subf %180, %181 : vector<1x1xf32>
    %183 = vector.broadcast %182 : vector<1x1xf32> to vector<2x1xf32>
    %184 = arith.mulf %183, %179 : vector<2x1xf32>
    %cst_63 = arith.constant 1.000000e+00 : f32
    %185 = vector.broadcast %cst_63 : f32 to vector<2x1xf32>
    %186 = arith.addf %185, %184 : vector<2x1xf32>
    %cst_64 = arith.constant 0.000000e+00 : f32
    %187 = vector.broadcast %cst_64 : f32 to vector<2x1xf32>
    %188 = arith.subf %187, %178 : vector<2x1xf32>
    %cst_65 = arith.constant 0.000000e+00 : f32
    %189 = vector.broadcast %cst_65 : f32 to vector<2x1xf32>
    %190 = arith.maximumf %188, %189 : vector<2x1xf32>
    %191 = math.absf %178 : vector<2x1xf32>
    %cst_66 = arith.constant 0.000000e+00 : f32
    %192 = vector.broadcast %cst_66 : f32 to vector<2x1xf32>
    %193 = arith.subf %192, %191 : vector<2x1xf32>
    %194 = math.exp %193 : vector<2x1xf32>
    %cst_67 = arith.constant 1.000000e+00 : f32
    %195 = vector.broadcast %cst_67 : f32 to vector<2x1xf32>
    %196 = arith.addf %195, %194 : vector<2x1xf32>
    %cst_68 = arith.constant 1.000000e+00 : f32
    %197 = vector.broadcast %cst_68 : f32 to vector<2x1xf32>
    %198 = arith.cmpf oeq, %196, %197 : vector<2x1xf32>
    %199 = math.log %196 : vector<2x1xf32>
    %cst_69 = arith.constant 1.000000e+00 : f32
    %200 = vector.broadcast %cst_69 : f32 to vector<2x1xf32>
    %201 = arith.subf %196, %200 : vector<2x1xf32>
    %202 = arith.divf %194, %201 : vector<2x1xf32>
    %203 = arith.mulf %199, %202 : vector<2x1xf32>
    %204 = arith.select %198, %194, %203 : vector<2x1xi1>, vector<2x1xf32>
    %205 = arith.addf %190, %204 : vector<2x1xf32>
    %cst_70 = arith.constant 1.000000e+00 : f32
    %206 = vector.broadcast %cst_70 : f32 to vector<2x1xf32>
    %207 = arith.subf %206, %179 : vector<2x1xf32>
    %208 = arith.mulf %207, %178 : vector<2x1xf32>
    %209 = arith.mulf %186, %205 : vector<2x1xf32>
    %210 = arith.addf %208, %209 : vector<2x1xf32>
    %cst_71 = arith.constant dense<0.000000e+00> : vector<1xf32>
    %211 = vector.multi_reduction <add>, %210, %cst_71 [0] : vector<2x1xf32> to vector<1xf32>
    %212 = vector.shape_cast %211 : vector<1xf32> to vector<1x1xf32>
    %cst_72 = arith.constant 2.000000e+00 : f32
    %213 = vector.broadcast %cst_72 : f32 to vector<1x1xf32>
    %214 = arith.divf %212, %213 : vector<1x1xf32>
    %215 = vector.shape_cast %178 : vector<2x1xf32> to vector<2x1xf32>
    %216 = vector.broadcast %215 : vector<2x1xf32> to vector<2x128xf32>
    %c0_73 = arith.constant 0 : index
    %c0_74 = arith.constant 0 : index
    %217 = vector.load %arg16[%c0_73, %c0_74] : memref<2x128xf32, #tpu.memory_space<vmem>>, vector<2x128xf32>
    tpu.vector_store %arg16[%c0_73, %c0_74], %216 {strides = array<i32>} : memref<2x128xf32, #tpu.memory_space<vmem>>, vector<2x128xf32>,
    %218 = vector.shape_cast %214 : vector<1x1xf32> to vector<1x1xf32>
    %219 = vector.broadcast %218 : vector<1x1xf32> to vector<1x128xf32>
    %c0_75 = arith.constant 0 : index
    %c0_76 = arith.constant 0 : index
    %220 = vector.load %arg17[%c0_75, %c0_76] : memref<1x128xf32, #tpu.memory_space<vmem>>, vector<1x128xf32>
    tpu.vector_store %arg17[%c0_75, %c0_76], %219 {strides = array<i32>} : memref<1x128xf32, #tpu.memory_space<vmem>>, vector<1x128xf32>,
    return
  }
}

</mosaic_0001>

<bundles_post_ra>
// kernel: biencoder_forward.1
= control target key start
LH: loop header
LB: loop body
LE: loop exit
PB: predicated region body
PF: predicated region fallthrough
CT: control target
= control target key end

     0   :  { %s2706_s0 = inlined_call_operand.vmem [shape: s32[32,1], index: 0, kind: input, shape index: {}]   ;;  %s2707_s1 = inlined_call_operand.vmem [shape: f32[32,1], index: 1, kind: input, shape index: {}]   ;;  %s2708_s2 = inlined_call_operand.vmem [shape: f32[1,32], index: 2, kind: input, shape index: {}]   ;;  %s2709_s3 = inlined_call_operand.vmem [shape: f32[2,1], index: 3, kind: input, shape index: {}]   ;;  %s2710_s4 = inlined_call_operand.<no memory space> [shape: f32[1,1], index: 4, kind: input, shape index: {}]   ;;  %s2711_s5 = inlined_call_operand.hbm [shape: f32[128,128], index: 5, kind: input, shape index: {}]   ;;  %s2712_s6 = inlined_call_operand.vmem [shape: f32[2,128], index: 6, kind: input, shape index: {}]   ;;  %s2713_s7 = inlined_call_operand.hbm [shape: f32[32,128], index: 7, kind: input, shape index: {}]   ;;  %s2714_s8 = inlined_call_operand.hbm [shape: f32[32,32], index: 8, kind: input, shape index: {}]   ;;  %s2715_s9 = inlined_call_operand.hbm [shape: bf16[128,384], index: 9, kind: input, shape index: {}]   ;;  %s2716_s10 = inlined_call_operand.vmem [shape: bf16[128,128], index: 10, kind: input, shape index: {}]   ;;  %s2717_s11 = inlined_call_operand.hbm [shape: bf16[128,128], index: 11, kind: input, shape index: {}]   ;;  %s2718_s12 = inlined_call_operand.hbm [shape: bf16[128,128], index: 12, kind: input, shape index: {}]   ;;  %s2719_s13 = inlined_call_operand.hbm [shape: f32[6,128], index: 13, kind: input, shape index: {}]   ;;  %s2720_s14 = inlined_call_operand.vmem [shape: bf16[128,128], index: 14, kind: input, shape index: {}]   ;;  %s2721_s15 = inlined_call_operand.hbm [shape: f32[1,128], index: 15, kind: input, shape index: {}]   ;;  %s2722_s16 = inlined_call_operand.vmem [shape: f32[2,128], index: 16, kind: output, shape index: {0}]   ;;  %s2723_s17 = inlined_call_operand.hbm [shape: f32[1,128], index: 17, kind: output, shape index: {1}]  }
   0x1   :  { %2728 = sst [smem:[#allocation24_spill]] %s2706_s0  ;;  %v23_v0 = vstv %s2710_s4 }
   0x2   :  { %2729 = sst [smem:[#allocation25_spill]] %s2707_s1  ;;  %24 = vst [vmem:[#allocation2] sm:$0x1] %v23_v0 }
   0x3   :  { %25 = vsyncpa [#allocation4], 0 }
   0x4   :  { %26 = vsyncpa [#allocation7], 0 }
   0x5   :  { %27 = vsyncpa [#allocation10], 0 }
   0x6   :  { %28 = vsyncpa [#allocation13], 0 }
   0x7   :  { %29 = vsyncpa [#allocation16], 0 }
   0x8   :  { %30 = vsyncpa [#allocation5], 0  ;;  %s2254_s26 = smov [#allocation6]   ;;  %s2255_s28 = smov [#allocation9]  }
   0x9   :  { %s60_s27 = sshll.u32 %s2254_s26, 4  ;;  %s84_s29 = sshll.u32 %s2255_s28, 4  ;;  %s61_s27 = int_to_ptr.vmem [resolvable:$true] %s60_s27  ;;  %s2365_s29 = int_to_ptr.vmem [resolvable:$true] %s84_s29 }
   0xa   :  { %s2044_s18 = scalar_lea.hbm %s2713_s7, 512 }
   0xb   :  { %p2045_p0 = scmp.ne.s32.totalorder %s2713_s7, %s2044_s18  ;;  %p2048_p1 = scmp.lt.u32.totalorder %s2044_s18, %s2713_s7 }
   0xd   :  { %p2050_p2 = pnand %p2048_p1, %p2045_p0 }
   0xf   :  { %2053 = shalt.err (!%p2050_p2)
}
  0x10   :  { %s2054_s21 = scalar_lea.vmem %s61_s27, 512  ;;  %p2059_p4 = scmp.lt.s32.totalorder %s61_s27, %s61_s27 }
  0x11   :  { %p2055_p3 = scmp.ne.s32.totalorder %s61_s27, %s2054_s21  ;;  %p2060_p5 = scmp.lt.s32.totalorder %s2054_s21, %s2054_s21 }
  0x13   :  { %p2061_p6 = por %p2060_p5, %p2059_p4 }
  0x15   :  { %p2062_p7 = pnand %p2061_p6, %p2055_p3 }
  0x17   :  { %2065 = shalt.err (!%p2062_p7)
}
  0x18   :  { %s2726_s22 = smov 128   ;;  %s2257_s23 = smov 8  }
  0x19   :  { %66 = dma.hbm_to_vmem [thread:$0]  %s2713_s7, 512, %s61_s27, [#allocation7], %s2726_s22, %s2726_s22, %s2257_s23  }
  0x1a   :  { %s2066_s0 = scalar_lea.hbm %s2715_s9, 3072 }
  0x1b   :  { %p2067_p8 = scmp.ne.s32.totalorder %s2715_s9, %s2066_s0  ;;  %p2070_p9 = scmp.lt.u32.totalorder %s2066_s0, %s2715_s9 }
  0x1d   :  { %p2072_p10 = pnand %p2070_p9, %p2067_p8 }
  0x1f   :  { %2075 = shalt.err (!%p2072_p10)
}
  0x20   :  { %s2076_s1 = scalar_lea.vmem %s2365_s29, 3072  ;;  %p2081_p12 = scmp.lt.s32.totalorder %s2365_s29, %s2365_s29 }
  0x21   :  { %p2077_p11 = scmp.ne.s32.totalorder %s2365_s29, %s2076_s1  ;;  %p2082_p13 = scmp.lt.s32.totalorder %s2076_s1, %s2076_s1 }
  0x23   :  { %p2083_p0 = por %p2082_p13, %p2081_p12 }
  0x25   :  { %p2084_p1 = pnand %p2083_p0, %p2077_p11 }
  0x27   :  { %2087 = shalt.err (!%p2084_p1)
}
  0x28   :  { %s2258_s7 = smov 192   ;;  %s2259_s27 = smov 12  }
  0x29   :  { %90 = dma.hbm_to_vmem [thread:$0]  %s2715_s9, 3072, %s2365_s29, [#allocation10], %s2258_s7, %s2258_s7, %s2259_s27  }
  0x2a   :  { %s2260_s24 = smov [#allocation12]   ;;  %s2261_s26 = smov [#allocation3]  }
  0x2b   :  { %s110_s25 = sshll.u32 %s2260_s24, 4  ;;  %s46_s28 = sshll.u32 %s2261_s26, 4  ;;  %s111_s25 = int_to_ptr.vmem [resolvable:$true] %s110_s25  ;;  %s2399_s28 = int_to_ptr.vmem [resolvable:$true] %s46_s28 }
  0x2c   :  { %s2088_s18 = scalar_lea.hbm %s2718_s12, 1024 }
  0x2d   :  { %p2089_p2 = scmp.ne.s32.totalorder %s2718_s12, %s2088_s18  ;;  %p2092_p3 = scmp.lt.u32.totalorder %s2088_s18, %s2718_s12 }
  0x2f   :  { %p2094_p4 = pnand %p2092_p3, %p2089_p2 }
  0x31   :  { %2097 = shalt.err (!%p2094_p4)
}
  0x32   :  { %s2098_s9 = scalar_lea.vmem %s111_s25, 1024  ;;  %p2103_p6 = scmp.lt.s32.totalorder %s111_s25, %s111_s25 }
  0x33   :  { %p2099_p5 = scmp.ne.s32.totalorder %s111_s25, %s2098_s9  ;;  %p2104_p7 = scmp.lt.s32.totalorder %s2098_s9, %s2098_s9 }
  0x35   :  { %p2105_p8 = por %p2104_p7, %p2103_p6 }
  0x37   :  { %p2106_p9 = pnand %p2105_p8, %p2099_p5 }
  0x39   :  { %2109 = shalt.err (!%p2106_p9)
}
  0x3a   :  { %s2262_s29 = smov 64   ;;  %s2263_s7 = smov 4  }
  0x3b   :  { %116 = dma.hbm_to_vmem [thread:$0]  %s2718_s12, 1024, %s111_s25, [#allocation13], %s2262_s29, %s2262_s29, %s2263_s7  }
  0x3c   :  { %s2110_s24 = scalar_lea.hbm %s2711_s5, 2048 }
  0x3d   :  { %p2111_p10 = scmp.ne.s32.totalorder %s2711_s5, %s2110_s24  ;;  %p2114_p11 = scmp.lt.u32.totalorder %s2110_s24, %s2711_s5 }
  0x3f   :  { %p2116_p12 = pnand %p2114_p11, %p2111_p10 }
  0x41   :  { %2119 = shalt.err (!%p2116_p12)
}
  0x42   :  { %s2120_s19 = scalar_lea.vmem %s2399_s28, 2048  ;;  %p2125_p0 = scmp.lt.s32.totalorder %s2399_s28, %s2399_s28 }
  0x43   :  { %p2121_p13 = scmp.ne.s32.totalorder %s2399_s28, %s2120_s19  ;;  %p2126_p1 = scmp.lt.s32.totalorder %s2120_s19, %s2120_s19 }
  0x45   :  { %p2127_p2 = por %p2126_p1, %p2125_p0 }
  0x47   :  { %p2128_p3 = pnand %p2127_p2, %p2121_p13 }
  0x49   :  { %2131 = shalt.err (!%p2128_p3)
}
  0x4a   :  { %s2730_s12 = smov 128   ;;  %s2264_s1 = smov [#allocation8]  }
  0x4b   :  { %52 = dma.hbm_to_vmem [thread:$0]  %s2711_s5, 2048, %s2399_s28, [#allocation4], %s2730_s12, %s2730_s12, %s2257_s23  }
  0x4c   :  { %s72_s9 = sshll.u32 %s2264_s1, 4  ;;  %s2265_s27 = smov [#allocation11]   ;;  %s73_s9 = int_to_ptr.vmem [resolvable:$true] %s72_s9 }
  0x4d   :  { %s98_s20 = sshll.u32 %s2265_s27, 4  ;;  %s2132_s24 = scalar_lea.hbm %s2714_s8, 512  ;;  %s2436_s20 = int_to_ptr.vmem [resolvable:$true] %s98_s20 }
  0x4e   :  { %p2133_p4 = scmp.ne.s32.totalorder %s2714_s8, %s2132_s24  ;;  %p2136_p5 = scmp.lt.u32.totalorder %s2132_s24, %s2714_s8 }
  0x50   :  { %p2138_p6 = pnand %p2136_p5, %p2133_p4 }
  0x52   :  { %2141 = shalt.err (!%p2138_p6)
}
  0x53   :  { %s2142_s5 = scalar_lea.vmem %s73_s9, 512  ;;  %p2147_p8 = scmp.lt.s32.totalorder %s73_s9, %s73_s9 }
  0x54   :  { %p2143_p7 = scmp.ne.s32.totalorder %s73_s9, %s2142_s5  ;;  %p2148_p9 = scmp.lt.s32.totalorder %s2142_s5, %s2142_s5 }
  0x56   :  { %p2149_p10 = por %p2148_p9, %p2147_p8 }
  0x58   :  { %p2150_p11 = pnand %p2149_p10, %p2143_p7 }
  0x5a   :  { %2153 = shalt.err (!%p2150_p11)
}
  0x5b   :  { %78 = dma.hbm_to_vmem [thread:$0]  %s2714_s8, 512, %s73_s9, [#allocation7], %s2730_s12, %s2730_s12, %s2257_s23  }
  0x5c   :  { %s2154_s1 = scalar_lea.hbm %s2717_s11, 1024 }
  0x5d   :  { %p2155_p12 = scmp.ne.s32.totalorder %s2717_s11, %s2154_s1  ;;  %p2158_p13 = scmp.lt.u32.totalorder %s2154_s1, %s2717_s11 }
  0x5f   :  { %p2160_p0 = pnand %p2158_p13, %p2155_p12 }
  0x61   :  { %2163 = shalt.err (!%p2160_p0)
}
  0x62   :  { %s2164_s26 = scalar_lea.vmem %s2436_s20, 1024  ;;  %p2169_p2 = scmp.lt.s32.totalorder %s2436_s20, %s2436_s20 }
  0x63   :  { %p2165_p1 = scmp.ne.s32.totalorder %s2436_s20, %s2164_s26  ;;  %p2170_p3 = scmp.lt.s32.totalorder %s2164_s26, %s2164_s26 }
  0x65   :  { %p2171_p4 = por %p2170_p3, %p2169_p2 }
  0x67   :  { %p2172_p5 = pnand %p2171_p4, %p2165_p1 }
  0x69   :  { %2175 = shalt.err (!%p2172_p5)
}
  0x6a   :  { %104 = dma.hbm_to_vmem [thread:$0]  %s2717_s11, 1024, %s2436_s20, [#allocation10], %s2262_s29, %s2262_s29, %s2263_s7  }
  0x6b   :  { %s2266_s12 = smov [#allocation14]   ;;  %s2267_s0 = smov [#allocation15]  }
  0x6c   :  { %s123_s9 = sshll.u32 %s2266_s12, 4  ;;  %s135_s30 = sshll.u32 %s2267_s0, 4  ;;  %s124_s9 = int_to_ptr.vmem [resolvable:$true] %s123_s9  ;;  %s136_s30 = int_to_ptr.vmem [resolvable:$true] %s135_s30 }
  0x6d   :  { %s2176_s28 = scalar_lea.hbm %s2719_s13, 128 }
  0x6e   :  { %p2177_p6 = scmp.ne.s32.totalorder %s2719_s13, %s2176_s28  ;;  %p2180_p7 = scmp.lt.u32.totalorder %s2176_s28, %s2719_s13 }
  0x70   :  { %p2182_p8 = pnand %p2180_p7, %p2177_p6 }
  0x72   :  { %2185 = shalt.err (!%p2182_p8)
}
  0x73   :  { %s2186_s11 = scalar_lea.vmem %s124_s9, 128  ;;  %p2191_p10 = scmp.lt.s32.totalorder %s124_s9, %s124_s9 }
  0x74   :  { %p2187_p9 = scmp.ne.s32.totalorder %s124_s9, %s2186_s11  ;;  %p2192_p11 = scmp.lt.s32.totalorder %s2186_s11, %s2186_s11 }
  0x76   :  { %p2193_p12 = por %p2192_p11, %p2191_p10 }
  0x78   :  { %p2194_p13 = pnand %p2193_p12, %p2187_p9 }
  0x7a   :  { %2197 = shalt.err (!%p2194_p13)
}
  0x7b   :  { %126 = dma.hbm_to_vmem [thread:$0]  %s2719_s13, 128, %s124_s9, [#allocation13]  }
  0x7c   :  { %s2198_s22 = scalar_lea.hbm %s2721_s15, 16 }
  0x7d   :  { %p2199_p0 = scmp.ne.s32.totalorder %s2721_s15, %s2198_s22  ;;  %p2202_p1 = scmp.lt.u32.totalorder %s2198_s22, %s2721_s15 }
  0x7f   :  { %p2204_p2 = pnand %p2202_p1, %p2199_p0 }
  0x81   :  { %2207 = shalt.err (!%p2204_p2)
}
  0x82   :  { %s2208_s23 = scalar_lea.vmem %s136_s30, 16  ;;  %s2212_s12 = scalar_lea.vmem %s136_s30, 32 }
  0x83   :  { %p2209_p3 = scmp.ne.s32.totalorder %s136_s30, %s2208_s23  ;;  %p2213_p4 = scmp.lt.s32.totalorder %s136_s30, %s136_s30 }
  0x84   :  { %p2214_p5 = scmp.lt.s32.totalorder %s2212_s12, %s2208_s23 }
  0x86   :  { %p2215_p6 = por %p2214_p5, %p2213_p4 }
  0x88   :  { %p2216_p7 = pnand %p2215_p6, %p2209_p3 }
  0x8a   :  { %2219 = shalt.err (!%p2216_p7)
}
  0x8b   :  { %138 = dma.hbm_to_vmem [thread:$0]  %s2721_s15, 16, %s136_s30, [#allocation16]  }
  0x8c   :  { %2242 = dma.done.wait [#allocation4], 2048  }
  0x8d   :  { %2243 = vsyncadd [#allocation4], 4294965248 }
  0x8e   :  { %2244 = dma.done.wait [#allocation7], 1024  }
  0x8f   :  { %2245 = vsyncadd [#allocation7], 4294966272 }
  0x90   :  { %2246 = dma.done.wait [#allocation10], 4096  }
  0x91   :  { %2247 = vsyncadd [#allocation10], 4294963200 }
  0x92   :  { %2248 = dma.done.wait [#allocation13], 1152  }
  0x93   :  { %2249 = vsyncadd [#allocation13], 4294966144 }
  0x94   :  { %2250 = dma.done.wait [#allocation16], 16  }
  0x95   :  { %2251 = vsyncadd [#allocation16], 4294967280  ;;  %v2268_v1 = vmov 0   ;;  %s2731_s15 = sld [smem:[#allocation24_spill]]  ;;  %v198_v6 = vld [vmem:[#allocation3] sm:$0xff]  ;;  %v199_v7 = vld [vmem:[#allocation3 + $0x8] sm:$0xff]  ;;  %v165_v34 = vlaneseq }
  0x96   :  { %1925 = vset.pattern.permute.xlu1 %v2268_v1  ;;  %1924 = vset.pattern.permute.xlu0 %v2268_v1  ;;  %v200_v8 = vld [vmem:[#allocation3 + $0x10] sm:$0xff]  ;;  %v201_v9 = vld [vmem:[#allocation3 + $0x18] sm:$0xff]  ;;  %v1874_v10 = vpack.c.bf16 %v199_v7, %v198_v6  ;;  %v202_v12 = vld [vmem:[#allocation3 + $0x20] sm:$0xff]  ;;  %s2732_s29 = sld [smem:[#allocation25_spill]]  ;;  %v2269_v38 = vmov 1.0   ;;  %vm748_vm5 = vcmask 261120  }
  0x97   :  { %606 = vmatprep.mubr.bf16.mxu1 %v2268_v1  ;;  %v1878_v11 = vpack.c.bf16 %v201_v9, %v200_v8  ;;  %v203_v13 = vld [vmem:[#allocation3 + $0x28] sm:$0xff]  ;;  %v204_v19 = vld [vmem:[#allocation3 + $0x30] sm:$0xff]  ;;  %v205_v20 = vld [vmem:[#allocation3 + $0x38] sm:$0xff]  ;;  %v2524_v35 = vand.u32 127, %v165_v34  ;;  %v2530_v41 = vshrl.u32 %v165_v34, 7  ;;  %vm1494_vm6 = vcmask 1041409  }
  0x98   :  { %1875 = vmatprep.subr.bf16.mxu0 %v1874_v10  ;;  %v1882_v18 = vpack.c.bf16 %v203_v13, %v202_v12  ;;  %v206_v21 = vld [vmem:[#allocation3 + $0x40] sm:$0xff]  ;;  %v207_v22 = vld [vmem:[#allocation3 + $0x48] sm:$0xff]  ;;  %v1886_v23 = vpack.c.bf16 %v205_v20, %v204_v19  ;;  %v208_v24 = vld [vmem:[#allocation3 + $0x50] sm:$0xff]  ;;  %v2270_v19 = vmov 0.0   ;;  %vm1497_vm7 = vcmask 1041408  }
  0x99   :  { %1877 = vmatpush3.bf16.msra.mxu0 %v1874_v10  ;;  %v209_v25 = vld [vmem:[#allocation3 + $0x58] sm:$0xff]  ;;  %v1890_v26 = vpack.c.bf16 %v207_v22, %v206_v21  ;;  %v210_v27 = vld [vmem:[#allocation3 + $0x60] sm:$0xff]  ;;  %v211_v28 = vld [vmem:[#allocation3 + $0x68] sm:$0xff]  ;;  %v241_v42 = vsub.s32 1, %v2530_v41  ;;  %v2539_v46 = vsub.s32 0, %v2530_v41  ;;  %vm167_vm4 = vcmp.lt.s32.totalorder %v2524_v35, 32 }
  0x9a   :  { %1879 = vmatprep.subr.bf16.mxu0 %v1878_v11  ;;  %v1894_v29 = vpack.c.bf16 %v209_v25, %v208_v24  ;;  %v212_v30 = vld [vmem:[#allocation3 + $0x70] sm:$0xff]  ;;  %v213_v31 = vld [vmem:[#allocation3 + $0x78] sm:$0xff]  ;;  %v1898_v32 = vpack.c.bf16 %v211_v28, %v210_v27  ;;  %v341_v57 = vld [vmem:[#allocation6 + $0x8] sm:$0xff]  ;;  %v2543_v20 = vsel %vm167_vm4, 1.0, %v2270_v19  ;;  %vm1532_vm9 = vcmask 1024  }
  0x9b   :  { %v172_v2 = vld [vmem:[%s2731_s15 + $0x10] sm:$0xff]  ;;  %v170_v3 = vld [vmem:[%s2731_s15] sm:$0xff]  ;;  %v173_v4 = vld [vmem:[%s2731_s15 + $0x18] sm:$0xff]  ;;  %v1902_v33 = vpack.c.bf16 %v213_v31, %v212_v30 }
  0x9c   :  { %181 = vperm.xlu1 %1925, %v172_v2   ;;  %175 = vperm.xlu0 %1924, %v170_v3   ;;  %v171_v5 = vld [vmem:[%s2731_s15 + $0x8] sm:$0xff]  ;;  %v215_v15 = vld [vmem:[%s2732_s29] sm:$0xff]  ;;  %v218_v16 = vld [vmem:[%s2732_s29 + $0x18] sm:$0xff] }
  0x9d   :  { %v216_v14 = vld [vmem:[%s2732_s29 + $0x8] sm:$0xff]  ;;  %v217_v17 = vld [vmem:[%s2732_s29 + $0x10] sm:$0xff]  ;;  %1881 = vmatpush3.bf16.msra.mxu0 %v1878_v11  ;;  %v214_v43 = vld [vmem:[%s2712_s6] sm:$0x3] }
  0x9e   :  { %1883 = vmatprep.subr.bf16.mxu0 %v1882_v18  ;;  %v242_v44 = vrot.slane %v214_v43, %v241_v42  ;;  %v250_v49 = vrot.slane %v214_v43, %v2539_v46  ;;  %v340_v60 = vld [vmem:[#allocation6] sm:$0xff]  ;;  %v343_v10 = vld [vmem:[#allocation6 + $0x18] sm:$0xff] }
  0x9f   :  { %v1926_v12 = vld [vmem:[#allocation9 + $0x4] ss:$12 sps:$4 sm:$0xff]   ;;  %v1928_v13 = vld [vmem:[#allocation9] ss:$12 sps:$4 sm:$0xff]  }
  0xa0   :  { %184 = vperm.xlu1 %1925, %v173_v4   ;;  %178 = vperm.xlu0 %1924, %v171_v5   ;;  %v342_v5 = vld [vmem:[#allocation6 + $0x10] sm:$0xff]  ;;  %v1936_v43 = vld [vmem:[#allocation9 + $0x4c] ss:$12 sps:$4 sm:$0xff]  }
  0xa1   :  { %1885 = vmatpush3.bf16.msra.mxu0 %v1882_v18  ;;  %574 = vmatprep.subr.bf16.mxu1 %v1926_v12 }
  0xa2   :  { %1887 = vmatprep.subr.bf16.mxu0 %v1886_v23  ;;  %575 = vmatpush1.bf16.msra.mxu1 %v1928_v13 }
  0xa4   :  { %226 = vperm.xlu1 %1925, %v216_v14   ;;  %221 = vperm.xlu0 %1924, %v215_v15   ;;  %v1929_v14 = vld [vmem:[#allocation9 + $0x1c] ss:$12 sps:$4 sm:$0xff]   ;;  %v1931_v15 = vld [vmem:[#allocation9 + $0x18] ss:$12 sps:$4 sm:$0xff]  }
  0xa5   :  { %1889 = vmatpush3.bf16.msra.mxu0 %v1886_v23  ;;  %576 = vmatprep.subr.bf16.mxu1 %v1929_v14 }
  0xa6   :  { %1891 = vmatprep.subr.bf16.mxu0 %v1890_v26  ;;  %577 = vmatpush1.bf16.msra.mxu1 %v1931_v15 }
  0xa8   :  { %236 = vperm.xlu1 %1925, %v218_v16   ;;  %231 = vperm.xlu0 %1924, %v217_v17  }
  0xa9   :  { %1893 = vmatpush3.bf16.msra.mxu0 %v1890_v26 }
  0xaa   :  { %1895 = vmatprep.subr.bf16.mxu0 %v1894_v29 }
  0xad   :  { %1897 = vmatpush3.bf16.msra.mxu0 %v1894_v29 }
  0xae   :  { %1899 = vmatprep.subr.bf16.mxu0 %v1898_v32 }
  0xb1   :  { %1901 = vmatpush3.bf16.msra.mxu0 %v1898_v32 }
  0xb2   :  { %1903 = vmatprep.subr.bf16.mxu0 %v1902_v33 }
  0xb5   :  { %1905 = vmatpush3.bf16.msra.mxu0 %v1902_v33 }
 0x11b   :  { %v182_v36 = vpop.permute.xlu1 %181  ;;  %v176_v37 = vpop.permute.xlu0 %175 }
 0x11c   :  { %vm186_vm0 = vcmp.eq.s32.totalorder %v176_v37, %v2524_v35  ;;  %vm188_vm1 = vcmp.eq.s32.totalorder %v182_v36, %v2524_v35 }
 0x11d   :  { %1752 = vmatprep.mubr.msk.f32.mxu0 %vm186_vm0, %v2269_v38 }
 0x11f   :  { %v179_v39 = vpop.permute.xlu0 %178  ;;  %v185_v40 = vpop.permute.xlu1 %184 }
 0x120   :  { %vm187_vm2 = vcmp.eq.s32.totalorder %v179_v39, %v2524_v35  ;;  %vm189_vm3 = vcmp.eq.s32.totalorder %v185_v40, %v2524_v35  ;;  %v1934_v39 = vld [vmem:[#allocation9 + $0x8] ss:$12 sps:$4 sm:$0xff]   ;;  %v1935_v40 = vld [vmem:[#allocation9 + $0x30] ss:$12 sps:$4 sm:$0xff]  }
 0x121   :  { %1753 = vmatmul.mubr.msk.f32.vlgmr.msra.gmra.mrb[0].mxu0 %vm187_vm2, %v2269_v38  ;;  %1758 = vmatprep.subr.bf16.mxu0 %v1934_v39 }
 0x122   :  { %1755 = vmatprep.mubr.msk.f32.mxu0 %vm188_vm1, %v2269_v38  ;;  %1759 = vmatpush3.bf16.msra.mxu0 %v1934_v39 }
 0x123   :  { %v222_v45 = vpop.permute.xlu0 %221  ;;  %v227_v47 = vpop.permute.xlu1 %226 }
 0x124   :  { %v244_v48 = vmul.f32 %v242_v44, %v227_v47  ;;  %v243_v50 = vmul.f32 %v242_v44, %v222_v45  ;;  %v1939_v45 = vld [vmem:[#allocation9 + $0x48] ss:$12 sps:$4 sm:$0xff]   ;;  %v1940_v47 = vld [vmem:[#allocation9 + $0x64] ss:$12 sps:$4 sm:$0xff]  }
 0x125   :  { %1756 = vmatmul.mubr.msk.f32.gmra.mrb[2].mxu0 %vm189_vm3, %v2269_v38  ;;  %v1932_v38 = vld [vmem:[#allocation9 + $0x34] ss:$12 sps:$4 sm:$0xff]  }
 0x126   :  { %v252_v53 = vadd.f32 %v250_v49, %v244_v48  ;;  %v251_v56 = vadd.f32 %v250_v49, %v243_v50  ;;  %578 = vmatprep.subr.bf16.mxu1 %v1932_v38  ;;  %v1942_v48 = vld [vmem:[#allocation9 + $0x38] ss:$12 sps:$4 sm:$0xff]   ;;  %v1944_v50 = vld [vmem:[#allocation9 + $0x7c] ss:$12 sps:$4 sm:$0xff]  }
 0x127   :  { %v232_v51 = vpop.permute.xlu0 %231  ;;  %v237_v52 = vpop.permute.xlu1 %236  ;;  %579 = vmatpush1.bf16.msra.mxu1 %v1935_v40 }
 0x128   :  { %v245_v54 = vmul.f32 %v242_v44, %v232_v51  ;;  %v246_v61 = vmul.f32 %v242_v44, %v237_v52  ;;  %v1938_v44 = vld [vmem:[#allocation9 + $0x20] ss:$12 sps:$4 sm:$0xff]   ;;  %580 = vmatprep.subr.bf16.mxu1 %v1936_v43  ;;  %v1946_v51 = vld [vmem:[#allocation9 + $0x50] ss:$12 sps:$4 sm:$0xff]   ;;  %v1947_v52 = vld [vmem:[#allocation9 + $0x78] ss:$12 sps:$4 sm:$0xff]  }
 0x129   :  { %1760 = vmatprep.subr.bf16.mxu0 %v1938_v44 }
 0x12a   :  { %v253_v2 = vadd.f32 %v250_v49, %v245_v54  ;;  %v254_v6 = vadd.f32 %v250_v49, %v246_v61  ;;  %1761 = vmatpush3.bf16.msra.mxu0 %v1938_v44  ;;  %v1943_v49 = vld [vmem:[#allocation9 + $0x60] ss:$12 sps:$4 sm:$0xff]   ;;  %v1950_v54 = vld [vmem:[#allocation9 + $0x68] ss:$12 sps:$4 sm:$0xff]  }
 0x12b   :  { %581 = vmatpush1.bf16.msra.mxu1 %v1939_v45  ;;  %1762 = vmatprep.subr.bf16.mxu0 %v1942_v48 }
 0x12c   :  { %582 = vmatprep.subr.bf16.mxu1 %v1940_v47 }
 0x12e   :  { %1763 = vmatpush3.bf16.msra.mxu0 %v1942_v48 }
 0x12f   :  { %583 = vmatpush1.bf16.msra.mxu1 %v1943_v49  ;;  %1764 = vmatprep.subr.bf16.mxu0 %v1946_v51 }
 0x130   :  { %584 = vmatprep.subr.bf16.mxu1 %v1944_v50 }
 0x132   :  { %1765 = vmatpush3.bf16.msra.mxu0 %v1946_v51  ;;  %v735_v51 = vld [vmem:[%s2708_s2] sm:$0x1] }
 0x133   :  { %585 = vmatpush1.bf16.msra.mxu1 %v1947_v52  ;;  %1766 = vmatprep.subr.bf16.mxu0 %v1950_v54  ;;  %v736_v52 = vsub.f32 1.0, %v735_v51 }
 0x136   :  { %1767 = vmatpush3.bf16.msra.mxu0 %v1950_v54  ;;  %v684_v54 = vld [vmem:[#allocation8 + $0x10] sm:$0xff] }
 0x1f4   :  { %v1754_v55 = vpop.f32.mrb[0].mxu0 }
 0x1f5   :  { %v327_v58 = vadd.f32 %v1754_v55, %v252_v53  ;;  %v321_v59 = vpop.f32.mrb[1].mxu0  ;;  %v1948_v53 = vld [vmem:[#allocation9 + $0x94] ss:$12 sps:$4 sm:$0xff]   ;;  %v1951_v55 = vld [vmem:[#allocation9 + $0x90] ss:$12 sps:$4 sm:$0xff]  }
 0x1f6   :  { %v322_v62 = vadd.f32 %v321_v59, %v251_v56  ;;  %v1952_v56 = vld [vmem:[#allocation9 + $0xac] ss:$12 sps:$4 sm:$0xff]   ;;  %586 = vmatprep.subr.bf16.mxu1 %v1948_v53  ;;  %v737_v53 = vmul.f32 -1e+09, %v736_v52 }
 0x1f7   :  { %v345_v63 = vadd.f32 %v341_v57, %v327_v58  ;;  %v1954_v57 = vld [vmem:[#allocation9 + $0x80] ss:$12 sps:$4 sm:$0xff]   ;;  %587 = vmatpush1.bf16.msra.mxu1 %v1951_v55  ;;  %v1955_v58 = vld [vmem:[#allocation9 + $0xa8] ss:$12 sps:$4 sm:$0xff]   ;;  %v1956_v59 = vld [vmem:[#allocation9 + $0x98] ss:$12 sps:$4 sm:$0xff]  }
 0x1f8   :  { %v1757_v0 = vpop.f32.mrb[2].mxu0  ;;  %v344_v3 = vadd.f32 %v340_v60, %v322_v62  ;;  %588 = vmatprep.subr.bf16.mxu1 %v1952_v56  ;;  %1768 = vmatprep.subr.bf16.mxu0 %v1954_v57  ;;  %v1957_v60 = vld [vmem:[#allocation9 + $0xb0] ss:$12 sps:$4 sm:$0xff]   ;;  %v682_v55 = vld [vmem:[#allocation8] sm:$0xff] }
 0x1f9   :  { %350 = vadd.xlane.f32.xlu1 %v345_v63  ;;  %v331_v4 = vpop.f32.mrb[3].mxu0  ;;  %v337_v8 = vadd.f32 %v1757_v0, %v254_v6  ;;  %1769 = vmatpush3.bf16.msra.mxu0 %v1954_v57  ;;  %v742_v57 = vrot.slane %v737_v53, %v2539_v46 }
 0x1fa   :  { %v332_v7 = vadd.f32 %v331_v4, %v253_v2  ;;  %348 = vadd.xlane.f32.xlu0 %v344_v3  ;;  %1770 = vmatprep.subr.bf16.mxu0 %v1956_v59 }
 0x1fb   :  { %v347_v11 = vadd.f32 %v343_v10, %v337_v8  ;;  %589 = vmatpush1.bf16.msra.mxu1 %v1955_v58 }
 0x1fc   :  { %v346_v9 = vadd.f32 %v342_v5, %v332_v7 }
 0x1fd   :  { %1771 = vmatpush3.bf16.msra.mxu0 %v1956_v59  ;;  %v685_v59 = vld [vmem:[#allocation8 + $0x18] sm:$0xff] }
 0x1fe   :  { %352 = vadd.xlane.f32.xlu0 %v346_v9  ;;  %1772 = vmatprep.subr.bf16.mxu0 %v1957_v60 }
 0x201   :  { %1773 = vmatpush3.bf16.msra.mxu0 %v1957_v60  ;;  %v683_v60 = vld [vmem:[#allocation8 + $0x8] sm:$0xff] }
 0x202   :  { %354 = vadd.xlane.f32.xlu0 %v347_v11 }
 0x286   :  { %v351_v16 = vpop.xlane.xlu1 %350 }
 0x287   :  { %v357_v17 = vmul.f32 0.03125, %v351_v16  ;;  %v349_v18 = vpop.xlane.xlu0 %348 }
 0x288   :  { %v356_v21 = vmul.f32 0.03125, %v349_v18 }
 0x289   :  { %v361_v22 = vsub.f32 %v345_v63, %v357_v17 }
 0x28a   :  { %v360_v23 = vsub.f32 %v344_v3, %v356_v21 }
 0x28b   :  { %v353_v24 = vpop.xlane.xlu0 %352  ;;  %v2546_v25 = vmul.f32 %v2543_v20, %v361_v22 }
 0x28c   :  { %v358_v26 = vmul.f32 0.03125, %v353_v24  ;;  %v2549_v27 = vmul.f32 %v2543_v20, %v360_v23 }
 0x28d   :  { %v369_v28 = vmul.f32 %v2546_v25, %v2546_v25 }
 0x28e   :  { %v362_v29 = vsub.f32 %v346_v9, %v358_v26  ;;  %v368_v30 = vmul.f32 %v2549_v27, %v2549_v27  ;;  %v2565_v9 = vld [vmem:[#allocation14] sm:$0x3f] }
 0x28f   :  { %374 = vadd.xlane.f32.xlu0 %v369_v28  ;;  %v355_v31 = vpop.xlane.xlu0 %354  ;;  %v407_v14 = vrot.slane %v2565_v9, %v241_v42 }
 0x290   :  { %v359_v32 = vmul.f32 0.03125, %v355_v31  ;;  %372 = vadd.xlane.f32.xlu1 %v368_v30  ;;  %v2556_v33 = vmul.f32 %v2543_v20, %v362_v29 }
 0x292   :  { %v363_v34 = vsub.f32 %v347_v11, %v359_v32  ;;  %v370_v35 = vmul.f32 %v2556_v33, %v2556_v33  ;;  %v399_v11 = vrot.slane %v2565_v9, %v2539_v46 }
 0x294   :  { %376 = vadd.xlane.f32.xlu1 %v370_v35  ;;  %v2561_v36 = vmul.f32 %v2543_v20, %v363_v34 }
 0x296   :  { %v371_v37 = vmul.f32 %v2561_v36, %v2561_v36 }
 0x298   :  { %378 = vadd.xlane.f32.xlu0 %v371_v37 }
 0x31c   :  { %v375_v61 = vpop.xlane.xlu0 %374 }
 0x31d   :  { %v381_v62 = vmul.f32 0.03125, %v375_v61  ;;  %v373_v63 = vpop.xlane.xlu1 %372 }
 0x31e   :  { %v380_v0 = vmul.f32 0.03125, %v373_v63 }
 0x31f   :  { %v385_v2 = vadd.f32 1e-12, %v381_v62 }
 0x320   :  { %v384_v3 = vadd.f32 1e-12, %v380_v0 }
 0x321   :  { %1990 = vrsqrt.f32 %v385_v2  ;;  %v377_v4 = vpop.xlane.xlu1 %376 }
 0x322   :  { %1992 = vrsqrt.f32 %v384_v3  ;;  %v382_v5 = vmul.f32 0.03125, %v377_v4 }
 0x324   :  { %v386_v6 = vadd.f32 1e-12, %v382_v5 }
 0x325   :  { %v379_v7 = vpop.xlane.xlu0 %378 }
 0x326   :  { %1994 = vrsqrt.f32 %v386_v6  ;;  %v383_v8 = vmul.f32 0.03125, %v379_v7 }
 0x328   :  { %v387_v10 = vadd.f32 1e-12, %v383_v8 }
 0x32a   :  { %1996 = vrsqrt.f32 %v387_v10 }
 0x32b   :  { %v1991_v12 = vpop.eup %1990 }
 0x32c   :  { %v1993_v13 = vpop.eup %1992  ;;  %v393_v15 = vmul.f32 %v1991_v12, %v2546_v25 }
 0x32d   :  { %v392_v16 = vmul.f32 %v1993_v13, %v2549_v27 }
 0x32e   :  { %v401_v17 = vmul.f32 %v399_v11, %v393_v15 }
 0x32f   :  { %v400_v18 = vmul.f32 %v399_v11, %v392_v16 }
 0x330   :  { %v1995_v19 = vpop.eup %1994  ;;  %v2574_v21 = vadd.f32 %v407_v14, %v401_v17 }
 0x331   :  { %v2576_v22 = vadd.f32 %v407_v14, %v400_v18  ;;  %v394_v23 = vmul.f32 %v1995_v19, %v2556_v33 }
 0x333   :  { %v412_v24 = vpack.c.bf16 %v2574_v21, %v2576_v22  ;;  %v402_v25 = vmul.f32 %v399_v11, %v394_v23 }
 0x334   :  { %v1997_v26 = vpop.eup %1996 }
 0x335   :  { %607 = vmatmul.mubr.bf16.vlgmr.msra.gmra.mrb[0].mxu1 %v412_v24  ;;  %1774 = vmatprep.mubr.bf16.mxu0 %v412_v24  ;;  %v395_v42 = vmul.f32 %v1997_v26, %v2561_v36  ;;  %v2583_v28 = vadd.f32 %v407_v14, %v402_v25 }
 0x336   :  { %616 = vmatprep.mubr.bf16.mxu1 %v2268_v1 }
 0x337   :  { %v403_v27 = vmul.f32 %v399_v11, %v395_v42 }
 0x339   :  { %v2585_v29 = vadd.f32 %v407_v14, %v403_v27 }
 0x33b   :  { %v413_v30 = vpack.c.bf16 %v2585_v29, %v2583_v28 }
 0x33d   :  { %617 = vmatmul.mubr.bf16.gmra.mrb[4].mxu1 %v413_v30  ;;  %1775 = vmatmul.mubr.bf16.vlgmr.msra.gmra.mrb[4].mxu0 %v413_v30 }
 0x408   :  { %v608_v31 = vpop.f32.mrb[0].mxu1 }
 0x409   :  { %v610_v32 = vpop.f32.mrb[1].mxu1 }
 0x40a   :  { %v612_v33 = vpop.f32.mrb[2].mxu1 }
 0x40b   :  { %v676_v34 = vpack.c.bf16 %v612_v33, %v608_v31  ;;  %v614_v35 = vpop.f32.mrb[3].mxu1 }
 0x40c   :  { %v678_v37 = vpack.c.bf16 %v614_v35, %v610_v32 }
 0x40d   :  { %1782 = vmatprep.mubr.bf16.mxu1 %v676_v34 }
 0x40e   :  { %1778 = vmatprep.subr.bf16.mxu1 %v678_v37 }
 0x40f   :  { %1779 = vmatpush3.bf16.xpose.msra.mxu1 %v678_v37 }
 0x410   :  { %v618_v1 = vpop.f32.mrb[4].mxu1  ;;  %v1776_v36 = vpop.f32.mrb[4].mxu0 }
 0x411   :  { %v620_v38 = vpop.f32.mrb[5].mxu1  ;;  %v661_v39 = vpop.f32.mrb[5].mxu0 }
 0x412   :  { %v622_v40 = vpop.f32.mrb[6].mxu1  ;;  %v1777_v43 = vpop.f32.mrb[6].mxu0 }
 0x413   :  { %v677_v44 = vpack.c.bf16 %v622_v40, %v618_v1  ;;  %v681_v45 = vpack.c.bf16 %v1777_v43, %v1776_v36  ;;  %v624_v47 = vpop.f32.mrb[7].mxu1  ;;  %v664_v48 = vpop.f32.mrb[7].mxu0  ;;  %v1958_v1 = vld [vmem:[%s2716_s10] sm:$0xff]  }
 0x414   :  { %v679_v49 = vpack.c.bf16 %v624_v47, %v620_v38  ;;  %v680_v50 = vpack.c.bf16 %v664_v48, %v661_v39 }
 0x416   :  { %1780 = vmatprep.subr.bf16.mxu1 %v679_v49 }
 0x417   :  { %1781 = vmatpush3.bf16.xpose.msra.mxu1 %v679_v49 }
 0x418   :  { %1786 = vmatprep.subr.bf16.mxu1 %v680_v50 }
 0x41e   :  { %1783 = vmatmul.mubr.bf16.vlgmr.msra.gmra.mrb[8].mxu1 %v677_v44 }
 0x41f   :  { %1787 = vmatpush3.bf16.msra.mxu1 %v680_v50 }
 0x420   :  { %1788 = vmatprep.subr.bf16.mxu1 %v681_v45 }
 0x423   :  { %1789 = vmatpush3.bf16.msra.mxu1 %v681_v45 }
 0x424   :  { %1794 = vmatprep.subr.bf16.mxu1 %v1958_v1 }
 0x4f1   :  { %v1784_v56 = vpop.f32.mrb[8].mxu1 }
 0x4f2   :  { %v720_v58 = vpop.f32.mrb[9].mxu1  ;;  %v729_v61 = vadd.f32 %v1784_v56, %v684_v54  ;;  %v1959_v54 = vld [vmem:[%s2716_s10 + $0x8] sm:$0xff]   ;;  %v1961_v56 = vld [vmem:[%s2716_s10 + $0x18] sm:$0xff]  }
 0x4f3   :  { %v721_v62 = vadd.f32 %v720_v58, %v682_v55  ;;  %v1785_v63 = vpop.f32.mrb[10].mxu1  ;;  %v1960_v55 = vld [vmem:[%s2716_s10 + $0x10] sm:$0xff]   ;;  %v1963_v58 = vld [vmem:[%s2716_s10 + $0x28] sm:$0xff]  }
 0x4f4   :  { %v723_v0 = vpop.f32.mrb[11].mxu1  ;;  %v732_v2 = vadd.f32 %v1785_v63, %v685_v59  ;;  %v746_v7 = vadd.f32 %v742_v57, %v729_v61  ;;  %v1964_v59 = vld [vmem:[%s2716_s10 + $0x30] sm:$0xff]  }
 0x4f5   :  { %v724_v3 = vadd.f32 %v723_v0, %v683_v60  ;;  %v744_v4 = vadd.f32 %v742_v57, %v721_v62  ;;  %v1965_v60 = vld [vmem:[%s2716_s10 + $0x38] sm:$0xff]  }
 0x4f6   :  { %v747_v10 = vadd.f32 %v742_v57, %v732_v2  ;;  %v755_v11 = vsel %vm748_vm5, %v746_v7, -inf }
 0x4f7   :  { %v749_v5 = vsel %vm748_vm5, %v744_v4, -inf  ;;  %v745_v6 = vadd.f32 %v742_v57, %v724_v3  ;;  %v1962_v57 = vld [vmem:[%s2716_s10 + $0x20] sm:$0xff]  }
 0x4f8   :  { %750 = vmax.xlane.f32.xlu1 %v749_v5  ;;  %v758_v12 = vsel %vm748_vm5, %v747_v10, -inf }
 0x4f9   :  { %v752_v8 = vsel %vm748_vm5, %v745_v6, -inf }
 0x4fa   :  { %753 = vmax.xlane.f32.xlu0 %v752_v8 }
 0x4fc   :  { %756 = vmax.xlane.f32.xlu1 %v755_v11 }
 0x4fe   :  { %759 = vmax.xlane.f32.xlu0 %v758_v12 }
 0x585   :  { %v751_v13 = vpop.xlane.xlu1 %750 }
 0x586   :  { %v761_v14 = vsub.f32 %v744_v4, %v751_v13  ;;  %v1966_v13 = vld [vmem:[#allocation11] sm:$0xff]  }
 0x587   :  { %v754_v15 = vpop.xlane.xlu0 %753  ;;  %1814 = vmatprep.subr.bf16.mxu0 %v1966_v13 }
 0x588   :  { %v765_v16 = vmul.f32 1.442695, %v761_v14  ;;  %v762_v17 = vsub.f32 %v745_v6, %v754_v15  ;;  %1815 = vmatpush3.bf16.msra.mxu0 %v1966_v13 }
 0x589   :  { %v757_v18 = vpop.xlane.xlu1 %756 }
 0x58a   :  { %1998 = vpow2.f32 %v765_v16  ;;  %v767_v19 = vmul.f32 1.442695, %v762_v17  ;;  %v763_v23 = vsub.f32 %v746_v7, %v757_v18 }
 0x58b   :  { %v760_v24 = vpop.xlane.xlu0 %759 }
 0x58c   :  { %2000 = vpow2.f32 %v767_v19  ;;  %v769_v26 = vmul.f32 1.442695, %v763_v23  ;;  %v764_v42 = vsub.f32 %v747_v10, %v760_v24 }
 0x58e   :  { %2002 = vpow2.f32 %v769_v26  ;;  %v771_v25 = vmul.f32 1.442695, %v764_v42 }
 0x590   :  { %2004 = vpow2.f32 %v771_v25 }
 0x594   :  { %v1999_v27 = vpop.eup %1998 }
 0x595   :  { %v773_v30 = vsel %vm748_vm5, %v1999_v27, 0.0 }
 0x596   :  { %v2001_v31 = vpop.eup %2000  ;;  %774 = vadd.xlane.f32.xlu1 %v773_v30 }
 0x597   :  { %v776_v32 = vsel %vm748_vm5, %v2001_v31, 0.0 }
 0x598   :  { %v2003_v33 = vpop.eup %2002  ;;  %777 = vadd.xlane.f32.xlu0 %v776_v32 }
 0x599   :  { %v779_v34 = vsel %vm748_vm5, %v2003_v33, 0.0 }
 0x59a   :  { %v2005_v35 = vpop.eup %2004  ;;  %780 = vadd.xlane.f32.xlu1 %v779_v34  ;;  %v1967_v34 = vld [vmem:[#allocation11 + $0x8] sm:$0xff]  }
 0x59b   :  { %v782_v37 = vsel %vm748_vm5, %v2005_v35, 0.0  ;;  %1816 = vmatprep.subr.bf16.mxu0 %v1967_v34 }
 0x59c   :  { %783 = vadd.xlane.f32.xlu0 %v782_v37  ;;  %1817 = vmatpush3.bf16.msra.mxu0 %v1967_v34  ;;  %v1969_v37 = vld [vmem:[#allocation11 + $0x18] sm:$0xff]  }
 0x623   :  { %v775_v36 = vpop.xlane.xlu1 %774 }
 0x624   :  { %2006 = vrcp.f32 %v775_v36  ;;  %v1971_v36 = vld [vmem:[#allocation11 + $0x28] sm:$0xff]  }
 0x625   :  { %v778_v38 = vpop.xlane.xlu0 %777 }
 0x626   :  { %2008 = vrcp.f32 %v778_v38  ;;  %v1972_v38 = vld [vmem:[#allocation11 + $0x30] sm:$0xff]  }
 0x627   :  { %v781_v39 = vpop.xlane.xlu1 %780 }
 0x628   :  { %2010 = vrcp.f32 %v781_v39  ;;  %v1973_v39 = vld [vmem:[#allocation11 + $0x38] sm:$0xff]  }
 0x629   :  { %v784_v40 = vpop.xlane.xlu0 %783 }
 0x62a   :  { %2012 = vrcp.f32 %v784_v40 }
 0x62e   :  { %v2007_v43 = vpop.eup %2006 }
 0x62f   :  { %v789_v45 = vmul.f32 %v2007_v43, %v1999_v27 }
 0x630   :  { %v2009_v44 = vpop.eup %2008 }
 0x631   :  { %v790_v47 = vmul.f32 %v2009_v44, %v2001_v31 }
 0x632   :  { %v2011_v48 = vpop.eup %2010 }
 0x633   :  { %v793_v49 = vpack.c.bf16 %v790_v47, %v789_v45  ;;  %v791_v51 = vmul.f32 %v2011_v48, %v2003_v33 }
 0x634   :  { %v2013_v50 = vpop.eup %2012 }
 0x635   :  { %v792_v52 = vmul.f32 %v2013_v50, %v2005_v35  ;;  %1790 = vmatprep.mubr.msk.bf16.mxu1 %vm748_vm5, %v793_v49  ;;  %v1968_v35 = vld [vmem:[#allocation11 + $0x10] sm:$0xff]  }
 0x636   :  { %1818 = vmatprep.subr.bf16.mxu0 %v1968_v35 }
 0x637   :  { %v794_v53 = vpack.c.bf16 %v792_v52, %v791_v51  ;;  %1819 = vmatpush3.bf16.msra.mxu0 %v1968_v35 }
 0x638   :  { %1820 = vmatprep.subr.bf16.mxu0 %v1969_v37 }
 0x639   :  { %1791 = vmatmul.mubr.msk.bf16.vlgmr.msra.gmra.mrb[12].mxu1 %vm748_vm5, %v794_v53 }
 0x63a   :  { %1795 = vmatpush3.bf16.msra.mxu1 %v1958_v1  ;;  %v1970_v1 = vld [vmem:[#allocation11 + $0x20] sm:$0xff]  }
 0x63b   :  { %1796 = vmatprep.subr.bf16.mxu1 %v1959_v54  ;;  %1821 = vmatpush3.bf16.msra.mxu0 %v1969_v37 }
 0x63c   :  { %1822 = vmatprep.subr.bf16.mxu0 %v1970_v1 }
 0x63e   :  { %1797 = vmatpush3.bf16.msra.mxu1 %v1959_v54 }
 0x63f   :  { %1798 = vmatprep.subr.bf16.mxu1 %v1960_v55  ;;  %1823 = vmatpush3.bf16.msra.mxu0 %v1970_v1 }
 0x640   :  { %1824 = vmatprep.subr.bf16.mxu0 %v1971_v36 }
 0x642   :  { %1799 = vmatpush3.bf16.msra.mxu1 %v1960_v55  ;;  %v1019_v55 = vsub.s32 2, %v2530_v41 }
 0x643   :  { %1800 = vmatprep.subr.bf16.mxu1 %v1961_v56  ;;  %1825 = vmatpush3.bf16.msra.mxu0 %v1971_v36 }
 0x644   :  { %1826 = vmatprep.subr.bf16.mxu0 %v1972_v38 }
 0x646   :  { %1801 = vmatpush3.bf16.msra.mxu1 %v1961_v56  ;;  %v1020_v56 = vrot.slane %v2565_v9, %v1019_v55 }
 0x647   :  { %1802 = vmatprep.subr.bf16.mxu1 %v1962_v57  ;;  %1827 = vmatpush3.bf16.msra.mxu0 %v1972_v38 }
 0x648   :  { %1828 = vmatprep.subr.bf16.mxu0 %v1973_v39 }
 0x64a   :  { %1803 = vmatpush3.bf16.msra.mxu1 %v1962_v57  ;;  %v1027_v57 = vsub.s32 3, %v2530_v41 }
 0x64b   :  { %1804 = vmatprep.subr.bf16.mxu1 %v1963_v58  ;;  %1829 = vmatpush3.bf16.msra.mxu0 %v1973_v39 }
 0x64e   :  { %1805 = vmatpush3.bf16.msra.mxu1 %v1963_v58 }
 0x64f   :  { %1806 = vmatprep.subr.bf16.mxu1 %v1964_v59 }
 0x652   :  { %1807 = vmatpush3.bf16.msra.mxu1 %v1964_v59 }
 0x653   :  { %1808 = vmatprep.subr.bf16.mxu1 %v1965_v60 }
 0x656   :  { %1809 = vmatpush3.bf16.msra.mxu1 %v1965_v60 }
 0x70c   :  { %v1792_v61 = vpop.f32.mrb[12].mxu1 }
 0x70d   :  { %v835_v62 = vpop.f32.mrb[13].mxu1 }
 0x70e   :  { %v1793_v63 = vpop.f32.mrb[14].mxu1 }
 0x70f   :  { %v851_v0 = vpack.c.bf16 %v1793_v63, %v1792_v61  ;;  %v838_v2 = vpop.f32.mrb[15].mxu1  ;;  %v1028_v63 = vrot.slane %v2565_v9, %v1027_v57 }
 0x710   :  { %v850_v3 = vpack.c.bf16 %v838_v2, %v835_v62 }
 0x712   :  { %1810 = vmatprep.mubr.bf16.mxu1 %v850_v3 }
 0x713   :  { %1811 = vmatmul.mubr.bf16.vlgmr.msra.gmra.mrb[16].mxu1 %v851_v0 }
 0x7e6   :  { %v1812_v4 = vpop.f32.mrb[16].mxu1 }
 0x7e7   :  { %v950_v5 = vpop.f32.mrb[17].mxu1  ;;  %v967_v11 = vadd.f32 %v1812_v4, %v2583_v28 }
 0x7e8   :  { %v965_v6 = vadd.f32 %v950_v5, %v2576_v22  ;;  %v1813_v7 = vpop.f32.mrb[18].mxu1 }
 0x7e9   :  { %v953_v8 = vpop.f32.mrb[19].mxu1  ;;  %v968_v12 = vadd.f32 %v1813_v7, %v2585_v29 }
 0x7ea   :  { %v966_v10 = vadd.f32 %v953_v8, %v2574_v21  ;;  %969 = vadd.xlane.f32.xlu1 %v965_v6 }
 0x7ec   :  { %971 = vadd.xlane.f32.xlu0 %v966_v10 }
 0x7ee   :  { %973 = vadd.xlane.f32.xlu1 %v967_v11 }
 0x7f0   :  { %975 = vadd.xlane.f32.xlu0 %v968_v12 }
 0x877   :  { %v970_v14 = vpop.xlane.xlu1 %969 }
 0x878   :  { %v977_v15 = vmul.f32 0.03125, %v970_v14 }
 0x879   :  { %v972_v16 = vpop.xlane.xlu0 %971 }
 0x87a   :  { %v981_v17 = vsub.f32 %v965_v6, %v977_v15  ;;  %v978_v22 = vmul.f32 0.03125, %v972_v16  ;;  %v1974_v15 = vld [vmem:[#allocation12] sm:$0xff]   ;;  %v1975_v16 = vld [vmem:[#allocation12 + $0x8] sm:$0xff]  }
 0x87b   :  { %v974_v18 = vpop.xlane.xlu1 %973  ;;  %1834 = vmatprep.subr.bf16.mxu1 %v1974_v15 }
 0x87c   :  { %v982_v19 = vsub.f32 %v966_v10, %v978_v22  ;;  %v979_v23 = vmul.f32 0.03125, %v974_v18  ;;  %v985_v21 = vmul.f32 %v2543_v20, %v981_v17  ;;  %1835 = vmatpush3.bf16.msra.mxu1 %v1974_v15  ;;  %v1976_v17 = vld [vmem:[#allocation12 + $0x10] sm:$0xff]   ;;  %v1977_v22 = vld [vmem:[#allocation12 + $0x18] sm:$0xff]   ;;  %v1978_v18 = vld [vmem:[#allocation12 + $0x20] sm:$0xff]  }
 0x87d   :  { %v976_v24 = vpop.xlane.xlu0 %975  ;;  %1836 = vmatprep.subr.bf16.mxu1 %v1975_v16 }
 0x87e   :  { %v983_v28 = vsub.f32 %v967_v11, %v979_v23  ;;  %v980_v26 = vmul.f32 0.03125, %v976_v24  ;;  %v989_v42 = vmul.f32 %v985_v21, %v985_v21  ;;  %v986_v29 = vmul.f32 %v2543_v20, %v982_v19  ;;  %v1979_v19 = vld [vmem:[#allocation12 + $0x28] sm:$0xff]   ;;  %v1980_v23 = vld [vmem:[#allocation12 + $0x30] sm:$0xff]  }
 0x880   :  { %v984_v25 = vsub.f32 %v968_v12, %v980_v26  ;;  %993 = vadd.xlane.f32.xlu1 %v989_v42  ;;  %v990_v27 = vmul.f32 %v986_v29, %v986_v29  ;;  %v987_v30 = vmul.f32 %v2543_v20, %v983_v28  ;;  %1837 = vmatpush3.bf16.msra.mxu1 %v1975_v16 }
 0x881   :  { %1838 = vmatprep.subr.bf16.mxu1 %v1976_v17 }
 0x882   :  { %995 = vadd.xlane.f32.xlu0 %v990_v27  ;;  %v991_v31 = vmul.f32 %v987_v30, %v987_v30  ;;  %v988_v32 = vmul.f32 %v2543_v20, %v984_v25 }
 0x884   :  { %997 = vadd.xlane.f32.xlu1 %v991_v31  ;;  %v992_v33 = vmul.f32 %v988_v32, %v988_v32  ;;  %1839 = vmatpush3.bf16.msra.mxu1 %v1976_v17  ;;  %v1982_v17 = vld [vmem:[%s2720_s14] sm:$0xff]  }
 0x885   :  { %1840 = vmatprep.subr.bf16.mxu1 %v1977_v22  ;;  %1854 = vmatprep.subr.bf16.mxu0 %v1982_v17 }
 0x886   :  { %999 = vadd.xlane.f32.xlu0 %v992_v33 }
 0x888   :  { %1841 = vmatpush3.bf16.msra.mxu1 %v1977_v22 }
 0x889   :  { %1842 = vmatprep.subr.bf16.mxu1 %v1978_v18 }
 0x88c   :  { %1843 = vmatpush3.bf16.msra.mxu1 %v1978_v18 }
 0x88d   :  { %1844 = vmatprep.subr.bf16.mxu1 %v1979_v19 }
 0x890   :  { %1845 = vmatpush3.bf16.msra.mxu1 %v1979_v19 }
 0x891   :  { %1846 = vmatprep.subr.bf16.mxu1 %v1980_v23 }
 0x894   :  { %1847 = vmatpush3.bf16.msra.mxu1 %v1980_v23 }
 0x90d   :  { %v994_v40 = vpop.xlane.xlu1 %993 }
 0x90e   :  { %v1001_v43 = vmul.f32 0.03125, %v994_v40 }
 0x90f   :  { %v996_v44 = vpop.xlane.xlu0 %995 }
 0x910   :  { %v1005_v45 = vadd.f32 1e-12, %v1001_v43  ;;  %v1002_v47 = vmul.f32 0.03125, %v996_v44 }
 0x911   :  { %v998_v48 = vpop.xlane.xlu1 %997 }
 0x912   :  { %2014 = vrsqrt.f32 %v1005_v45  ;;  %v1006_v49 = vadd.f32 1e-12, %v1002_v47  ;;  %v1003_v50 = vmul.f32 0.03125, %v998_v48 }
 0x913   :  { %v1000_v51 = vpop.xlane.xlu0 %999 }
 0x914   :  { %2016 = vrsqrt.f32 %v1006_v49  ;;  %v1007_v52 = vadd.f32 1e-12, %v1003_v50  ;;  %v1004_v53 = vmul.f32 0.03125, %v1000_v51 }
 0x916   :  { %2018 = vrsqrt.f32 %v1007_v52  ;;  %v1008_v54 = vadd.f32 1e-12, %v1004_v53 }
 0x918   :  { %2020 = vrsqrt.f32 %v1008_v54 }
 0x91c   :  { %v2015_v58 = vpop.eup %2014 }
 0x91d   :  { %v1013_v59 = vmul.f32 %v2015_v58, %v985_v21  ;;  %v1981_v21 = vld [vmem:[#allocation12 + $0x38] sm:$0xff]  }
 0x91e   :  { %v2017_v60 = vpop.eup %2016  ;;  %1848 = vmatprep.subr.bf16.mxu1 %v1981_v21 }
 0x91f   :  { %v1014_v61 = vmul.f32 %v2017_v60, %v986_v29  ;;  %v1021_v62 = vmul.f32 %v1020_v56, %v1013_v59  ;;  %1849 = vmatpush3.bf16.msra.mxu1 %v1981_v21 }
 0x920   :  { %v2019_v0 = vpop.eup %2018 }
 0x921   :  { %v1015_v2 = vmul.f32 %v2019_v0, %v987_v30  ;;  %v1022_v3 = vmul.f32 %v1020_v56, %v1014_v61  ;;  %v2639_v6 = vadd.f32 %v1028_v63, %v1021_v62 }
 0x922   :  { %v2021_v4 = vpop.eup %2020 }
 0x923   :  { %v1016_v5 = vmul.f32 %v2021_v4, %v988_v32  ;;  %v2641_v7 = vadd.f32 %v1028_v63, %v1022_v3  ;;  %v1023_v8 = vmul.f32 %v1020_v56, %v1015_v2 }
 0x925   :  { %v1033_v10 = vpack.c.bf16 %v2641_v7, %v2639_v6  ;;  %v1024_v11 = vmul.f32 %v1020_v56, %v1016_v5  ;;  %v2645_v12 = vadd.f32 %v1028_v63, %v1023_v8 }
 0x927   :  { %1830 = vmatprep.mubr.bf16.mxu0 %v1033_v10  ;;  %v2647_v13 = vadd.f32 %v1028_v63, %v1024_v11 }
 0x929   :  { %v1034_v14 = vpack.c.bf16 %v2647_v13, %v2645_v12 }
 0x92b   :  { %1831 = vmatmul.mubr.bf16.vlgmr.msra.gmra.mrb[8].mxu0 %v1034_v14 }
 0x92c   :  { %1855 = vmatpush3.bf16.msra.mxu0 %v1982_v17  ;;  %v1631_v17 = vld [vmem:[#allocation15] ss:$0 sm:$0xff] }
 0x9fe   :  { %v1832_v24 = vpop.f32.mrb[8].mxu0 }
 0x9ff   :  { %v1154_v28 = vmul.f32 0.044715, %v1832_v24  ;;  %v1133_v26 = vpop.f32.mrb[9].mxu0  ;;  %v1150_v55 = vmul.f32 0.5, %v1832_v24 }
 0xa00   :  { %v1152_v42 = vmul.f32 0.044715, %v1133_v26  ;;  %v1833_v29 = vpop.f32.mrb[10].mxu0  ;;  %v1148_v58 = vmul.f32 0.5, %v1133_v26 }
 0xa01   :  { %v1158_v25 = vmul.f32 %v1832_v24, %v1154_v28  ;;  %v1155_v27 = vmul.f32 0.044715, %v1833_v29  ;;  %v1136_v30 = vpop.f32.mrb[11].mxu0  ;;  %v1151_v56 = vmul.f32 0.5, %v1833_v29 }
 0xa02   :  { %v1156_v31 = vmul.f32 %v1152_v42, %v1133_v26  ;;  %v1153_v32 = vmul.f32 0.044715, %v1136_v30  ;;  %v1149_v59 = vmul.f32 0.5, %v1136_v30 }
 0xa03   :  { %v1162_v33 = vmul.f32 %v1832_v24, %v1158_v25  ;;  %v1159_v34 = vmul.f32 %v1833_v29, %v1155_v27 }
 0xa04   :  { %v1160_v35 = vmul.f32 %v1156_v31, %v1133_v26  ;;  %v1157_v37 = vmul.f32 %v1153_v32, %v1136_v30 }
 0xa05   :  { %v1166_v1 = vadd.f32 %v1832_v24, %v1162_v33  ;;  %v1163_v36 = vmul.f32 %v1833_v29, %v1159_v34  ;;  %v1983_v34 = vld [vmem:[%s2720_s14 + $0x8] sm:$0xff]  }
 0xa06   :  { %v1164_v38 = vadd.f32 %v1160_v35, %v1133_v26  ;;  %v1161_v39 = vmul.f32 %v1157_v37, %v1136_v30  ;;  %1856 = vmatprep.subr.bf16.mxu0 %v1983_v34  ;;  %v1984_v35 = vld [vmem:[%s2720_s14 + $0x10] sm:$0xff]   ;;  %v1985_v37 = vld [vmem:[%s2720_s14 + $0x18] sm:$0xff]  }
 0xa07   :  { %v1170_v40 = vmul.f32 0.7978846, %v1166_v1  ;;  %v1167_v43 = vadd.f32 %v1833_v29, %v1163_v36  ;;  %1857 = vmatpush3.bf16.msra.mxu0 %v1983_v34  ;;  %v1987_v1 = vld [vmem:[%s2720_s14 + $0x28] sm:$0xff]   ;;  %v1988_v36 = vld [vmem:[%s2720_s14 + $0x30] sm:$0xff]  }
 0xa08   :  { %v1168_v44 = vmul.f32 0.7978846, %v1164_v38  ;;  %v1165_v45 = vadd.f32 %v1161_v39, %v1136_v30  ;;  %1858 = vmatprep.subr.bf16.mxu0 %v1984_v35  ;;  %v1989_v38 = vld [vmem:[%s2720_s14 + $0x38] sm:$0xff]  }
 0xa09   :  { %2022 = vtanh.f32 %v1170_v40  ;;  %v1171_v47 = vmul.f32 0.7978846, %v1167_v43 }
 0xa0a   :  { %2024 = vtanh.f32 %v1168_v44  ;;  %v1169_v48 = vmul.f32 0.7978846, %v1165_v45 }
 0xa0b   :  { %2026 = vtanh.f32 %v1171_v47  ;;  %1859 = vmatpush3.bf16.msra.mxu0 %v1984_v35 }
 0xa0c   :  { %2028 = vtanh.f32 %v1169_v48  ;;  %1860 = vmatprep.subr.bf16.mxu0 %v1985_v37 }
 0xa0f   :  { %1861 = vmatpush3.bf16.msra.mxu0 %v1985_v37 }
 0xa13   :  { %v2023_v49 = vpop.eup %2022 }
 0xa14   :  { %v2025_v50 = vpop.eup %2024  ;;  %v1178_v51 = vadd.f32 1.0, %v2023_v49 }
 0xa15   :  { %v2027_v52 = vpop.eup %2026  ;;  %v1176_v53 = vadd.f32 1.0, %v2025_v50 }
 0xa16   :  { %v2029_v54 = vpop.eup %2028  ;;  %v1179_v57 = vadd.f32 1.0, %v2027_v52  ;;  %v1182_v61 = vmul.f32 %v1178_v51, %v1150_v55 }
 0xa17   :  { %v1177_v60 = vadd.f32 1.0, %v2029_v54  ;;  %v1180_v63 = vmul.f32 %v1176_v53, %v1148_v58  ;;  %v1353_v54 = vsub.s32 4, %v2530_v41 }
 0xa18   :  { %v1183_v62 = vmul.f32 %v1179_v57, %v1151_v56  ;;  %v1361_v56 = vsub.s32 5, %v2530_v41 }
 0xa19   :  { %v1181_v0 = vmul.f32 %v1177_v60, %v1149_v59  ;;  %v1354_v55 = vrot.slane %v2565_v9, %v1353_v54 }
 0xa1a   :  { %v1185_v2 = vpack.c.bf16 %v1183_v62, %v1182_v61  ;;  %v1362_v62 = vrot.slane %v2565_v9, %v1361_v56 }
 0xa1b   :  { %v1184_v3 = vpack.c.bf16 %v1181_v0, %v1180_v63 }
 0xa1d   :  { %1850 = vmatprep.mubr.bf16.mxu1 %v1184_v3 }
 0xa1e   :  { %1851 = vmatmul.mubr.bf16.vlgmr.msra.gmra.mrb[20].mxu1 %v1185_v2 }
 0xaf1   :  { %v1852_v4 = vpop.f32.mrb[20].mxu1 }
 0xaf2   :  { %v1284_v5 = vpop.f32.mrb[21].mxu1  ;;  %v1301_v15 = vadd.f32 %v1852_v4, %v2645_v12 }
 0xaf3   :  { %v1299_v8 = vadd.f32 %v1284_v5, %v2639_v6  ;;  %v1853_v10 = vpop.f32.mrb[22].mxu1 }
 0xaf4   :  { %v1287_v11 = vpop.f32.mrb[23].mxu1  ;;  %v1302_v16 = vadd.f32 %v1853_v10, %v2647_v13 }
 0xaf5   :  { %v1300_v14 = vadd.f32 %v1287_v11, %v2641_v7  ;;  %1303 = vadd.xlane.f32.xlu1 %v1299_v8 }
 0xaf7   :  { %1305 = vadd.xlane.f32.xlu0 %v1300_v14 }
 0xaf9   :  { %1307 = vadd.xlane.f32.xlu1 %v1301_v15 }
 0xafb   :  { %1309 = vadd.xlane.f32.xlu0 %v1302_v16 }
 0xb82   :  { %v1304_v22 = vpop.xlane.xlu1 %1303 }
 0xb83   :  { %v1311_v6 = vmul.f32 0.03125, %v1304_v22 }
 0xb84   :  { %v1306_v18 = vpop.xlane.xlu0 %1305 }
 0xb85   :  { %v1315_v19 = vsub.f32 %v1299_v8, %v1311_v6  ;;  %v1312_v23 = vmul.f32 0.03125, %v1306_v18 }
 0xb86   :  { %v1308_v7 = vpop.xlane.xlu1 %1307 }
 0xb87   :  { %v1316_v21 = vsub.f32 %v1300_v14, %v1312_v23  ;;  %v1313_v24 = vmul.f32 0.03125, %v1308_v7  ;;  %v1319_v12 = vmul.f32 %v2543_v20, %v1315_v19 }
 0xb88   :  { %v1310_v28 = vpop.xlane.xlu0 %1309 }
 0xb89   :  { %v1317_v13 = vsub.f32 %v1301_v15, %v1313_v24  ;;  %v1314_v26 = vmul.f32 0.03125, %v1310_v28  ;;  %v1323_v42 = vmul.f32 %v1319_v12, %v1319_v12  ;;  %v1320_v29 = vmul.f32 %v2543_v20, %v1316_v21 }
 0xb8b   :  { %v1318_v25 = vsub.f32 %v1302_v16, %v1314_v26  ;;  %1327 = vadd.xlane.f32.xlu1 %v1323_v42  ;;  %v1324_v27 = vmul.f32 %v1320_v29, %v1320_v29  ;;  %v1321_v30 = vmul.f32 %v2543_v20, %v1317_v13 }
 0xb8d   :  { %1329 = vadd.xlane.f32.xlu0 %v1324_v27  ;;  %v1325_v31 = vmul.f32 %v1321_v30, %v1321_v30  ;;  %v1322_v32 = vmul.f32 %v2543_v20, %v1318_v25  ;;  %v1986_v20 = vld [vmem:[%s2720_s14 + $0x20] sm:$0xff]  }
 0xb8e   :  { %1862 = vmatprep.subr.bf16.mxu0 %v1986_v20 }
 0xb8f   :  { %1331 = vadd.xlane.f32.xlu1 %v1325_v31  ;;  %v1326_v33 = vmul.f32 %v1322_v32, %v1322_v32  ;;  %1863 = vmatpush3.bf16.msra.mxu0 %v1986_v20  ;;  %v1501_v20 = vld [vmem:[%s2709_s3] sm:$0x3]  ;;  %s2271_s3 = smov [#allocation17]  }
 0xb90   :  { %1864 = vmatprep.subr.bf16.mxu0 %v1987_v1 }
 0xb91   :  { %1333 = vadd.xlane.f32.xlu0 %v1326_v33  ;;  %v1502_v33 = vld [vmem:[#allocation2] sm:$0x1] }
 0xb92   :  { %v1640_v34 = vadd.f32 -1.0, %v1502_v33 }
 0xb93   :  { %1865 = vmatpush3.bf16.msra.mxu0 %v1987_v1 }
 0xb94   :  { %1866 = vmatprep.subr.bf16.mxu0 %v1988_v36  ;;  %v1508_v35 = vrot.slane %v1640_v34, %v2539_v46 }
 0xb97   :  { %1867 = vmatpush3.bf16.msra.mxu0 %v1988_v36  ;;  %v1510_v36 = vmul.f32 %v1508_v35, %v1501_v20 }
 0xb98   :  { %1868 = vmatprep.subr.bf16.mxu0 %v1989_v38 }
 0xb9b   :  { %1869 = vmatpush3.bf16.msra.mxu0 %v1989_v38 }
 0xc18   :  { %v1328_v39 = vpop.xlane.xlu1 %1327 }
 0xc19   :  { %v1335_v40 = vmul.f32 0.03125, %v1328_v39 }
 0xc1a   :  { %v1330_v43 = vpop.xlane.xlu0 %1329 }
 0xc1b   :  { %v1339_v44 = vadd.f32 1e-12, %v1335_v40  ;;  %v1336_v45 = vmul.f32 0.03125, %v1330_v43 }
 0xc1c   :  { %v1332_v47 = vpop.xlane.xlu1 %1331 }
 0xc1d   :  { %2030 = vrsqrt.f32 %v1339_v44  ;;  %v1340_v48 = vadd.f32 1e-12, %v1336_v45  ;;  %v1337_v49 = vmul.f32 0.03125, %v1332_v47  ;;  %v1511_v44 = vadd.f32 1.0, %v1510_v36 }
 0xc1e   :  { %v1334_v50 = vpop.xlane.xlu0 %1333  ;;  %v1528_v45 = vsub.f32 1.0, %v1501_v20 }
 0xc1f   :  { %2032 = vrsqrt.f32 %v1340_v48  ;;  %v1341_v51 = vadd.f32 1e-12, %v1337_v49  ;;  %v1338_v52 = vmul.f32 0.03125, %v1334_v50 }
 0xc21   :  { %2034 = vrsqrt.f32 %v1341_v51  ;;  %v1342_v53 = vadd.f32 1e-12, %v1338_v52 }
 0xc23   :  { %2036 = vrsqrt.f32 %v1342_v53 }
 0xc27   :  { %v2031_v57 = vpop.eup %2030 }
 0xc28   :  { %v1347_v58 = vmul.f32 %v2031_v57, %v1319_v12 }
 0xc29   :  { %v2033_v59 = vpop.eup %2032 }
 0xc2a   :  { %v1348_v60 = vmul.f32 %v2033_v59, %v1320_v29  ;;  %v1355_v61 = vmul.f32 %v1354_v55, %v1347_v58 }
 0xc2b   :  { %v2035_v63 = vpop.eup %2034 }
 0xc2c   :  { %v1349_v0 = vmul.f32 %v2035_v63, %v1321_v30  ;;  %v1356_v2 = vmul.f32 %v1354_v55, %v1348_v60  ;;  %v1363_v5 = vadd.f32 %v1362_v62, %v1355_v61 }
 0xc2d   :  { %v2037_v3 = vpop.eup %2036 }
 0xc2e   :  { %v1350_v4 = vmul.f32 %v2037_v3, %v1322_v32  ;;  %v1364_v8 = vadd.f32 %v1362_v62, %v1356_v2  ;;  %v1357_v10 = vmul.f32 %v1354_v55, %v1349_v0 }
 0xc30   :  { %v1367_v11 = vpack.c.bf16 %v1364_v8, %v1363_v5  ;;  %v1358_v14 = vmul.f32 %v1354_v55, %v1350_v4  ;;  %v1365_v15 = vadd.f32 %v1362_v62, %v1357_v10 }
 0xc32   :  { %1870 = vmatprep.mubr.bf16.mxu0 %v1367_v11  ;;  %v1366_v41 = vadd.f32 %v1362_v62, %v1358_v14 }
 0xc34   :  { %v1368_v16 = vpack.c.bf16 %v1366_v41, %v1365_v15 }
 0xc36   :  { %1871 = vmatmul.mubr.bf16.vlgmr.msra.gmra.mrb[12].mxu0 %v1368_v16 }
 0xd09   :  { %v1872_v22 = vpop.f32.mrb[12].mxu0 }
 0xd0a   :  { %v1483_v6 = vadd.f32 %v1872_v22, %v1631_v17  ;;  %v1474_v18 = vpop.f32.mrb[13].mxu0 }
 0xd0b   :  { %v1475_v9 = vadd.f32 %v1631_v17, %v1474_v18  ;;  %v1873_v19 = vpop.f32.mrb[14].mxu0 }
 0xd0c   :  { %v1486_v23 = vadd.f32 %v1873_v19, %v1631_v17  ;;  %v1477_v7 = vpop.f32.mrb[15].mxu0 }
 0xd0d   :  { %v1489_v21 = vmul.f32 %v1483_v6, %v1475_v9  ;;  %v1478_v24 = vadd.f32 %v1631_v17, %v1477_v7 }
 0xd0f   :  { %v1490_v12 = vmul.f32 %v1486_v23, %v1478_v24 }
 0xd11   :  { %v1493_v28 = vrot.slane %v1490_v12, 7 }
 0xd13   :  { %v1495_v13 = vsel %vm1494_vm6, %v1493_v28, %v1489_v21 }
 0xd14   :  { %v1498_v26 = vsel %vm1497_vm7, %v1495_v13, 0.0 }
 0xd15   :  { %1499 = vadd.xlane.f32.xlu1 %v1498_v26 }
 0xda2   :  { %v1500_v42 = vpop.xlane.xlu1 %1499 }
 0xda3   :  { %v1514_v29 = vand.u32 2147483647, %v1500_v42  ;;  %1542 = vst [vmem:[%s2722_s16] sm:$0x3] %v1500_v42  ;;  %v1512_v38 = vsub.f32 0.0, %v1500_v42  ;;  %v1529_v50 = vmul.f32 %v1528_v45, %v1500_v42  ;;  %s1557_s16 = sshll.u32 %s2271_s3, 4  ;;  %s1558_s16 = int_to_ptr.vmem [resolvable:$true] %s1557_s16 }
 0xda4   :  { %s2220_s5 = scalar_lea.vmem %s1558_s16, 16  ;;  %s2224_s28 = scalar_lea.vmem %s1558_s16, 32 }
 0xda5   :  { %v1515_v25 = vsub.f32 0.0, %v1514_v29  ;;  %v1513_v47 = vmax.f32 %v1512_v38, 0.0  ;;  %p2221_p8 = scmp.ne.s32.totalorder %s1558_s16, %s2220_s5  ;;  %p2225_p9 = scmp.lt.s32.totalorder %s1558_s16, %s1558_s16 }
 0xda6   :  { %p2226_p10 = scmp.lt.s32.totalorder %s2224_s28, %s2220_s5 }
 0xda7   :  { %v1516_v27 = vmul.f32 1.442695, %v1515_v25 }
 0xda8   :  { %p2227_p11 = por %p2226_p10, %p2225_p9 }
 0xda9   :  { %2038 = vpow2.f32 %v1516_v27 }
 0xdaa   :  { %p2228_p12 = pnand %p2227_p11, %p2221_p8 }
 0xdb3   :  { %v2039_v30 = vpop.eup %2038 }
 0xdb4   :  { %v1518_v31 = vadd.f32 1.0, %v2039_v30 }
 0xdb6   :  { %2040 = vlog2.f32 %v1518_v31  ;;  %v1641_v32 = vadd.f32 -1.0, %v1518_v31  ;;  %vm1519_vm8 = vcmp.eq.f32.partialorder %v1518_v31, 1.0 }
 0xdb8   :  { %2042 = vrcp.f32 %v1641_v32 }
 0xdc0   :  { %v2041_v37 = vpop.eup %2040 }
 0xdc1   :  { %v1521_v39 = vmul.f32 0.6931472, %v2041_v37 }
 0xdc2   :  { %v2043_v1 = vpop.eup %2042 }
 0xdc3   :  { %v1524_v40 = vmul.f32 %v2043_v1, %v2039_v30 }
 0xdc5   :  { %v1525_v43 = vmul.f32 %v1524_v40, %v1521_v39 }
 0xdc7   :  { %v1526_v48 = vsel %vm1519_vm8, %v2039_v30, %v1525_v43 }
 0xdc8   :  { %v1527_v49 = vadd.f32 %v1526_v48, %v1513_v47 }
 0xdca   :  { %v1530_v51 = vmul.f32 %v1527_v49, %v1511_v44 }
 0xdcc   :  { %v1531_v46 = vadd.f32 %v1530_v51, %v1529_v50 }
 0xdce   :  { %v1533_v52 = vsel %vm1532_vm9, %v1531_v46, 0.0 }
 0xdcf   :  { %v1534_v53 = vrot.slane %v1533_v52, 4 }
 0xdd1   :  { %v1535_v54 = vadd.f32 %v1534_v53, %v1533_v52 }
 0xdd3   :  { %v1536_v55 = vrot.slane %v1535_v54, 2 }
 0xdd5   :  { %v1537_v56 = vadd.f32 %v1536_v55, %v1535_v54 }
 0xdd7   :  { %v1538_v57 = vrot.slane %v1537_v56, 1 }
 0xdd9   :  { %v1539_v58 = vadd.f32 %v1538_v57, %v1537_v56 }
 0xddb   :  { %v1541_v59 = vmul.f32 0.5, %v1539_v58 }
 0xddd   :  { %1545 = vperm.xlu0 %1924, %v1541_v59  }
 0xe5c   :  { %v1546_v60 = vpop.permute.xlu0 %1545 }
 0xe5d   :  { %1548 = vst [vmem:[#allocation17] sm:$0x1] %v1546_v60 }
 0xe5e   :  { %2231 = shalt.err (!%p2228_p12)
}
 0xe5f   :  { %s2232_s4 = scalar_lea.hbm %s2723_s17, 16 }
 0xe60   :  { %p2233_p13 = scmp.ne.s32.totalorder %s2723_s17, %s2232_s4  ;;  %p2236_p0 = scmp.lt.u32.totalorder %s2232_s4, %s2723_s17 }
 0xe62   :  { %p2238_p1 = pnand %p2236_p0, %p2233_p13 }
 0xe64   :  { %2241 = shalt.err (!%p2238_p1)
}
 0xe65   :  { %1560 = dma.vmem_to_hbm [thread:$0]  %s1558_s16, 16, %s2723_s17, [#allocation5]  }
 0xe66   :  { %2252 = dma.done.wait [#allocation5], 16  }
 0xe67   :  { %2253 = vsyncadd [#allocation5], 4294967280 }
 0xe68   :  { %1566 = vsyncpa [#allocation4], 1 }
 0xe69   :  { %1567 = vsyncpa [#allocation7], 1 }
 0xe6a   :  { %1568 = vsyncpa [#allocation10], 1 }
 0xe6b   :  { %1569 = vsyncpa [#allocation13], 1 }
 0xe6c   :  { %1570 = vsyncpa [#allocation16], 1 }
 0xe6d   :  { %1571 = vsyncpa [#allocation5], 1 }

</bundles_post_ra>
